<compile_context>
chip_gen: v7x
topology: tpu7x:2x2x1
jax: 0.10.0
libtpu: 0.0.40
codegen_flags: <defaults>
</compile_context>

<pallas_src>
import jax
import jax.numpy as jnp
from jax.experimental import pallas as pl
from jax.experimental.pallas import tpu as pltpu


def _round_up(x, m):
    return ((x + m - 1) // m) * m


def _lstm_layer_kernel(xproj_ref, whm_ref, h_out_ref, c_out_ref, h_scr, c_scr):
    """One grid step = one (batch-tile, time-chunk).

    xproj_ref : (T, BT, 4*Lp) bf16  precomputed x-projection (+bias) for the chunk
    whm_ref   : (Lp, 4*Lp)    f32   fused recurrent weight [wh | mh] (zero-padded)
    h_out_ref : (T, BT, Lp)   f32   hidden states for the chunk
    c_out_ref : (T, BT, Lp)   f32   cell states for the chunk
    h_scr/c_scr: VMEM (BT, Lp) f32  state carried across time-chunks
    """
    tc = pl.program_id(1)

    # Zero-init carried state at the start of each batch-tile's time sweep
    # (matches the PyTorch default h = c = zeros).
    @pl.when(tc == 0)
    def _():
        h_scr[...] = jnp.zeros_like(h_scr)
        c_scr[...] = jnp.zeros_like(c_scr)

    T = xproj_ref.shape[0]
    Lp = h_out_ref.shape[-1]

    def step(t, carry):
        h, c = carry  # f32, live in vregs for the whole chunk
        # Serial critical path per timestep: one fused f32 matmul + gate math.
        # The weight streams from VMEM each step (no vreg-pinning hoist).
        pre = xproj_ref[t].astype(jnp.float32) + jnp.dot(
            h, whm_ref[...], preferred_element_type=jnp.float32)  # (BT, 4Lp)
        # sigmoid(x) == 0.5 * tanh(0.5 * x) + 0.5  -> single EUP op per gate vreg.
        fused = 0.5 * jnp.tanh(0.5 * pre[:, : 3 * Lp]) + 0.5
        mem = jnp.tanh(pre[:, 3 * Lp:])
        hidden_g = fused[:, :Lp]
        forgot_g = fused[:, Lp: 2 * Lp]
        output_g = fused[:, 2 * Lp:]
        c_new = forgot_g * c + hidden_g * mem
        h_new = output_g * jnp.tanh(c_new)
        h_out_ref[t] = h_new.astype(h_out_ref.dtype)
        c_out_ref[t] = c_new.astype(c_out_ref.dtype)
        return (h_new, c_new)

    # Partial unroll: LLO scheduling visibility without blowing vreg live ranges.
    h_f, c_f = jax.lax.fori_loop(0, T, step, (h_scr[...], c_scr[...]),
                                 unroll=min(8, T))
    h_scr[...] = h_f
    c_scr[...] = c_f


def _build_fused_weights(params, Lp):
    """Fuse (wx, mx), (wh, mh), (b, bm) into 4-gate, lane-padded matrices."""
    wx, wh, b, mx, mh, bm = params
    L = wh.shape[0]
    pad_cols = lambda a: jnp.pad(a, ((0, 0), (0, Lp - L)))
    # Column (gate) order: [hidden | forgot | output | memory], each padded L -> Lp.
    wx4 = jnp.concatenate(
        [pad_cols(wx[:, i * L:(i + 1) * L]) for i in range(3)] + [pad_cols(mx)], axis=1)
    wh4 = jnp.concatenate(
        [pad_cols(wh[:, i * L:(i + 1) * L]) for i in range(3)] + [pad_cols(mh)], axis=1)
    b4 = jnp.concatenate(
        [pad_cols(b[:, i * L:(i + 1) * L]) for i in range(3)] + [pad_cols(bm)], axis=1)
    whm = jnp.pad(wh4, ((0, Lp - L), (0, 0)))        # (Lp, 4Lp), padded rows are zero
    return wx4, whm, b4


def lstm_layer_forward(x, params, *, batch_first=True, time_chunk=32,
                       batch_tile=None, xproj_dtype=jnp.bfloat16):
    """x: (B, S, In) if batch_first else (S, B, In). Returns (hidden, cell)."""
    wx, wh, b, mx, mh, bm = params
    L = wh.shape[0]
    if batch_first:
        B, S, In = x.shape
    else:
        S, B, In = x.shape

    Lp = _round_up(L, 128)            # lane-dense outputs / 128-aligned gate slices
    Bp = _round_up(B, 8)              # fill f32 sublanes
    T = max(1, min(time_chunk, S))    # timesteps per grid step (amortizes grid overhead)
    S_pad = _round_up(S, T)
    # One batch tile by default; set batch_tile = Bp // 2 on v7x (Bp >= 16) so the
    # "parallel" batch axis shards the recurrence across its 2 TensorCores.
    BT = Bp if batch_tile is None else min(batch_tile, Bp)
    assert Bp % BT == 0 and BT % 8 == 0

    wx4, whm, b4 = _build_fused_weights(params, Lp)

    # ---- Hoisted input projection (time-independent work) --------------------
    # One large f32 matmul over all timesteps with biases folded in, emitted
    # time-major (S_pad, Bp, 4Lp).  Stored in bf16: halves the dominant HBM
    # stream read by the kernel and halves its VMEM chunk.
    if batch_first:
        x_bm = x
    else:
        x_bm = jnp.transpose(x, (1, 0, 2))
    x_p = jnp.pad(x_bm, ((0, Bp - B), (0, 0), (0, 0)))
    xproj = (jnp.einsum("bsi,io->sbo", x_p.astype(jnp.float32), wx4,
                        preferred_element_type=jnp.float32) + b4).astype(xproj_dtype)
    xproj = jnp.pad(xproj, ((0, S_pad - S), (0, 0), (0, 0)))
    whm = whm.astype(jnp.float32)     # f32 recurrent matmul: no bf16 drift on h

    # ---- VMEM budget (double-buffered blocks + scratch) -----------------------
    xp_item = jnp.dtype(xproj_dtype).itemsize
    vmem_needed = (2 * T * BT * 4 * Lp * xp_item      # xproj chunk, double-buffered
                   + 2 * 2 * T * BT * Lp * 4          # h & c output chunks
                   + 2 * Lp * 4 * Lp * 4              # fused weight
                   + 2 * BT * Lp * 4)                 # carried-state scratch
    vmem_limit = int(min(max(vmem_needed + (4 << 20), 32 << 20), 64 << 20))

    grid = (Bp // BT, S_pad // T)
    grid_spec = pltpu.PrefetchScalarGridSpec(
        num_scalar_prefetch=0,
        grid=grid,
        in_specs=[
            pl.BlockSpec((T, BT, 4 * Lp), lambda bi, tc: (tc, bi, 0)),  # xproj chunk
            pl.BlockSpec((Lp, 4 * Lp), lambda bi, tc: (0, 0)),          # fused recurrent W
        ],
        out_specs=[
            pl.BlockSpec((T, BT, Lp), lambda bi, tc: (tc, bi, 0)),      # hidden chunk
            pl.BlockSpec((T, BT, Lp), lambda bi, tc: (tc, bi, 0)),      # cell chunk
        ],
        scratch_shapes=[
            pltpu.VMEM((BT, Lp), jnp.float32),   # carried h across chunks
            pltpu.VMEM((BT, Lp), jnp.float32),   # carried c across chunks
        ],
    )

    h_tm, c_tm = pl.pallas_call(
        _lstm_layer_kernel,
        out_shape=(
            jax.ShapeDtypeStruct((S_pad, Bp, Lp), jnp.float32),
            jax.ShapeDtypeStruct((S_pad, Bp, Lp), jnp.float32),
        ),
        grid_spec=grid_spec,
        compiler_params=pltpu.CompilerParams(
            dimension_semantics=("parallel", "arbitrary"),
            vmem_limit_bytes=vmem_limit,
        ),
    )(xproj, whm)

    h_full = h_tm[:S, :B, :L]
    c_full = c_tm[:S, :B, :L]
    if batch_first:
        return jnp.transpose(h_full, (1, 0, 2)), jnp.transpose(c_full, (1, 0, 2))
    return h_full, c_full


def init_params(key, input_dim, latent_dim):
    """Deterministic synthetic parameters (shapes match the nn.Linear layers)."""
    concat_dim = input_dim + latent_dim
    k1, k2, k3, k4 = jax.random.split(key, 4)
    bound_w = 1.0 / jnp.sqrt(concat_dim)
    # self.w : Linear(concat_dim, 3*latent_dim); stored transposed (concat, 3L)
    w_full = jax.random.uniform(k1, (concat_dim, 3 * latent_dim),
                                minval=-bound_w, maxval=bound_w, dtype=jnp.float32)
    b = jax.random.uniform(k2, (1, 3 * latent_dim),
                           minval=-bound_w, maxval=bound_w, dtype=jnp.float32)
    # self.memory_gate : Linear(concat_dim, latent_dim); stored transposed
    m_full = jax.random.uniform(k3, (concat_dim, latent_dim),
                                minval=-bound_w, maxval=bound_w, dtype=jnp.float32)
    bm = jax.random.uniform(k4, (1, latent_dim),
                            minval=-bound_w, maxval=bound_w, dtype=jnp.float32)
    # Split concat weights into x-part and h-part (cat([x,h]) @ W == x@Wx + h@Wh)
    wx, wh = w_full[:input_dim], w_full[input_dim:]
    mx, mh = m_full[:input_dim], m_full[input_dim:]
    return wx, wh, b, mx, mh, bm


def _reference_forward(x, params):
    """Pure-JAX f32 reference mirroring the PyTorch loop (batch_first=True)."""
    wx, wh, b, mx, mh, bm = params
    B = x.shape[0]
    L = wh.shape[0]
    h0 = jnp.zeros((B, L), jnp.float32)
    c0 = jnp.zeros((B, L), jnp.float32)

    def step(carry, x_t):
        h, c = carry
        fused = jax.nn.sigmoid(x_t @ wx + h @ wh + b)
        mem = jnp.tanh(x_t @ mx + h @ mh + bm)
        hidden_s, forgot_s, output_s = jnp.split(fused, 3, axis=-1)
        c_new = forgot_s * c + hidden_s * mem
        h_new = output_s * jnp.tanh(c_new)
        return (h_new, c_new), (h_new, c_new)

    x_tm = jnp.transpose(x, (1, 0, 2))
    _, (hs, cs) = jax.lax.scan(step, (h0, c0), x_tm)
    return jnp.transpose(hs, (1, 0, 2)), jnp.transpose(cs, (1, 0, 2))


if __name__ == "__main__":
    batch, seq, input_dim, latent_dim = 2, 8, 16, 32

    key = jax.random.PRNGKey(0)
    kx, kp = jax.random.split(key)
    x = jax.random.normal(kx, (batch, seq, input_dim), dtype=jnp.float32)
    params = init_params(kp, input_dim, latent_dim)

    hidden, cell = lstm_layer_forward(x, params, batch_first=True)
    jax.block_until_ready((hidden, cell))

    hidden_ref, cell_ref = _reference_forward(x, params)
    assert hidden.shape == (batch, seq, latent_dim)
    assert cell.shape == (batch, seq, latent_dim)
    # bf16 storage of the hoisted x-projection -> loosened tolerance vs f32 reference.
    assert jnp.allclose(hidden, hidden_ref, atol=2e-2, rtol=2e-2)
    assert jnp.allclose(cell, cell_ref, atol=2e-2, rtol=2e-2)

    print("KERNEL_OK")
</pallas_src>

<mosaic_0001>
module attributes {stable_mosaic.version = 11 : i64} {
  func.func @_lstm_layer_kernel(%arg0: i32, %arg1: i32, %arg2: memref<8x8x512xbf16, #tpu.memory_space<vmem>>, %arg3: memref<128x512xf32, #tpu.memory_space<vmem>>, %arg4: memref<8x8x128xf32, #tpu.memory_space<vmem>>, %arg5: memref<8x8x128xf32, #tpu.memory_space<vmem>>, %arg6: memref<8x128xf32, #tpu.memory_space<vmem>>, %arg7: memref<8x128xf32, #tpu.memory_space<vmem>>) attributes {dimension_semantics = [#tpu.dimension_semantics<parallel>, #tpu.dimension_semantics<arbitrary>], iteration_bounds = array<i64: 1, 1>, scalar_prefetch = 0 : i64, scratch_operands = 2 : i64, tpu.core_type = #tpu.core_type<tc>, window_params = [{transform_indices = @transform_0, window_bounds = array<i64: 8, 8, 512>}, {pipeline_mode = #tpu.pipeline_mode<synchronous>, transform_indices = @transform_1, window_bounds = array<i64: 128, 512>}, {transform_indices = @transform_2, window_bounds = array<i64: 8, 8, 128>}, {transform_indices = @transform_3, window_bounds = array<i64: 8, 8, 128>}]} {
    %c0_i32 = arith.constant 0 : i32
    %0 = arith.cmpi eq, %arg1, %c0_i32 : i32
    %1 = arith.extui %0 : i1 to i32
    %c0_i32_0 = arith.constant 0 : i32
    %2 = arith.cmpi ne, %1, %c0_i32_0 : i32
    scf.if %2 {
      %cst_104 = arith.constant 0.000000e+00 : f32
      %271 = vector.broadcast %cst_104 : f32 to vector<8x128xf32>
      %c0_105 = arith.constant 0 : index
      %c0_106 = arith.constant 0 : index
      %272 = vector.load %arg6[%c0_105, %c0_106] : memref<8x128xf32, #tpu.memory_space<vmem>>, vector<8x128xf32>
      tpu.vector_store %arg6[%c0_105, %c0_106], %271 {strides = array<i32>} : memref<8x128xf32, #tpu.memory_space<vmem>>, vector<8x128xf32>,
      %cst_107 = arith.constant 0.000000e+00 : f32
      %273 = vector.broadcast %cst_107 : f32 to vector<8x128xf32>
      %c0_108 = arith.constant 0 : index
      %c0_109 = arith.constant 0 : index
      %274 = vector.load %arg7[%c0_108, %c0_109] : memref<8x128xf32, #tpu.memory_space<vmem>>, vector<8x128xf32>
      tpu.vector_store %arg7[%c0_108, %c0_109], %273 {strides = array<i32>} : memref<8x128xf32, #tpu.memory_space<vmem>>, vector<8x128xf32>,
    } else {
    }
    %c0 = arith.constant 0 : index
    %c0_1 = arith.constant 0 : index
    %3 = vector.load %arg6[%c0, %c0_1] : memref<8x128xf32, #tpu.memory_space<vmem>>, vector<8x128xf32>
    %c0_2 = arith.constant 0 : index
    %c0_3 = arith.constant 0 : index
    %4 = vector.load %arg7[%c0_2, %c0_3] : memref<8x128xf32, #tpu.memory_space<vmem>>, vector<8x128xf32>
    %c0_i32_4 = arith.constant 0 : i32
    %5 = arith.index_cast %c0_i32_4 : i32 to index
    %c0_5 = arith.constant 0 : index
    %c0_6 = arith.constant 0 : index
    %6 = vector.load %arg2[%5, %c0_5, %c0_6] : memref<8x8x512xbf16, #tpu.memory_space<vmem>>, vector<1x8x512xbf16>
    %7 = vector.shape_cast %6 : vector<1x8x512xbf16> to vector<8x512xbf16>
    %8 = arith.extf %7 : vector<8x512xbf16> to vector<8x512xf32>
    %c0_7 = arith.constant 0 : index
    %c0_8 = arith.constant 0 : index
    %9 = vector.load %arg3[%c0_7, %c0_8] : memref<128x512xf32, #tpu.memory_space<vmem>>, vector<128x512xf32>
    %cst = arith.constant dense<0.000000e+00> : vector<8x512xf32>
    %10 = tpu.matmul %3, %9, %cst {dimension_numbers = #tpu.dot_dimension_numbers<[1], [0], [0], [1], [0, 0, 1, 1], [], []>} : vector<8x128xf32>, vector<128x512xf32>, vector<8x512xf32> -> vector<8x512xf32>
    %11 = arith.addf %8, %10 : vector<8x512xf32>
    %12 = vector.extract_strided_slice %11 {offsets = [0, 0], sizes = [8, 384], strides = [1, 1]} : vector<8x512xf32> to vector<8x384xf32>
    %cst_9 = arith.constant 5.000000e-01 : f32
    %13 = vector.broadcast %cst_9 : f32 to vector<8x384xf32>
    %14 = arith.mulf %13, %12 : vector<8x384xf32>
    %15 = math.tanh %14 : vector<8x384xf32>
    %cst_10 = arith.constant 5.000000e-01 : f32
    %16 = vector.broadcast %cst_10 : f32 to vector<8x384xf32>
    %17 = arith.mulf %16, %15 : vector<8x384xf32>
    %cst_11 = arith.constant 5.000000e-01 : f32
    %18 = vector.broadcast %cst_11 : f32 to vector<8x384xf32>
    %19 = arith.addf %17, %18 : vector<8x384xf32>
    %20 = vector.extract_strided_slice %11 {offsets = [0, 384], sizes = [8, 128], strides = [1, 1]} : vector<8x512xf32> to vector<8x128xf32>
    %21 = math.tanh %20 : vector<8x128xf32>
    %22 = vector.extract_strided_slice %19 {offsets = [0, 0], sizes = [8, 128], strides = [1, 1]} : vector<8x384xf32> to vector<8x128xf32>
    %23 = vector.extract_strided_slice %19 {offsets = [0, 128], sizes = [8, 128], strides = [1, 1]} : vector<8x384xf32> to vector<8x128xf32>
    %24 = vector.extract_strided_slice %19 {offsets = [0, 256], sizes = [8, 128], strides = [1, 1]} : vector<8x384xf32> to vector<8x128xf32>
    %25 = arith.mulf %23, %4 : vector<8x128xf32>
    %26 = arith.mulf %22, %21 : vector<8x128xf32>
    %27 = arith.addf %25, %26 : vector<8x128xf32>
    %28 = math.tanh %27 : vector<8x128xf32>
    %29 = arith.mulf %24, %28 : vector<8x128xf32>
    %30 = arith.index_cast %c0_i32_4 : i32 to index
    %c0_12 = arith.constant 0 : index
    %c0_13 = arith.constant 0 : index
    %31 = vector.load %arg4[%30, %c0_12, %c0_13] : memref<8x8x128xf32, #tpu.memory_space<vmem>>, vector<1x8x128xf32>
    %32 = vector.shape_cast %31 : vector<1x8x128xf32> to vector<8x128xf32>
    %33 = vector.shape_cast %29 : vector<8x128xf32> to vector<1x8x128xf32>
    tpu.vector_store %arg4[%30, %c0_12, %c0_13], %33 {strides = array<i32>} : memref<8x8x128xf32, #tpu.memory_space<vmem>>, vector<1x8x128xf32>,
    %34 = arith.index_cast %c0_i32_4 : i32 to index
    %c0_14 = arith.constant 0 : index
    %c0_15 = arith.constant 0 : index
    %35 = vector.load %arg5[%34, %c0_14, %c0_15] : memref<8x8x128xf32, #tpu.memory_space<vmem>>, vector<1x8x128xf32>
    %36 = vector.shape_cast %35 : vector<1x8x128xf32> to vector<8x128xf32>
    %37 = vector.shape_cast %27 : vector<8x128xf32> to vector<1x8x128xf32>
    tpu.vector_store %arg5[%34, %c0_14, %c0_15], %37 {strides = array<i32>} : memref<8x8x128xf32, #tpu.memory_space<vmem>>, vector<1x8x128xf32>,
    %c1_i32 = arith.constant 1 : i32
    %38 = arith.index_cast %c1_i32 : i32 to index
    %c0_16 = arith.constant 0 : index
    %c0_17 = arith.constant 0 : index
    %39 = vector.load %arg2[%38, %c0_16, %c0_17] : memref<8x8x512xbf16, #tpu.memory_space<vmem>>, vector<1x8x512xbf16>
    %40 = vector.shape_cast %39 : vector<1x8x512xbf16> to vector<8x512xbf16>
    %41 = arith.extf %40 : vector<8x512xbf16> to vector<8x512xf32>
    %c0_18 = arith.constant 0 : index
    %c0_19 = arith.constant 0 : index
    %42 = vector.load %arg3[%c0_18, %c0_19] : memref<128x512xf32, #tpu.memory_space<vmem>>, vector<128x512xf32>
    %cst_20 = arith.constant dense<0.000000e+00> : vector<8x512xf32>
    %43 = tpu.matmul %29, %42, %cst_20 {dimension_numbers = #tpu.dot_dimension_numbers<[1], [0], [0], [1], [0, 0, 1, 1], [], []>} : vector<8x128xf32>, vector<128x512xf32>, vector<8x512xf32> -> vector<8x512xf32>
    %44 = arith.addf %41, %43 : vector<8x512xf32>
    %45 = vector.extract_strided_slice %44 {offsets = [0, 0], sizes = [8, 384], strides = [1, 1]} : vector<8x512xf32> to vector<8x384xf32>
    %cst_21 = arith.constant 5.000000e-01 : f32
    %46 = vector.broadcast %cst_21 : f32 to vector<8x384xf32>
    %47 = arith.mulf %46, %45 : vector<8x384xf32>
    %48 = math.tanh %47 : vector<8x384xf32>
    %cst_22 = arith.constant 5.000000e-01 : f32
    %49 = vector.broadcast %cst_22 : f32 to vector<8x384xf32>
    %50 = arith.mulf %49, %48 : vector<8x384xf32>
    %cst_23 = arith.constant 5.000000e-01 : f32
    %51 = vector.broadcast %cst_23 : f32 to vector<8x384xf32>
    %52 = arith.addf %50, %51 : vector<8x384xf32>
    %53 = vector.extract_strided_slice %44 {offsets = [0, 384], sizes = [8, 128], strides = [1, 1]} : vector<8x512xf32> to vector<8x128xf32>
    %54 = math.tanh %53 : vector<8x128xf32>
    %55 = vector.extract_strided_slice %52 {offsets = [0, 0], sizes = [8, 128], strides = [1, 1]} : vector<8x384xf32> to vector<8x128xf32>
    %56 = vector.extract_strided_slice %52 {offsets = [0, 128], sizes = [8, 128], strides = [1, 1]} : vector<8x384xf32> to vector<8x128xf32>
    %57 = vector.extract_strided_slice %52 {offsets = [0, 256], sizes = [8, 128], strides = [1, 1]} : vector<8x384xf32> to vector<8x128xf32>
    %58 = arith.mulf %56, %27 : vector<8x128xf32>
    %59 = arith.mulf %55, %54 : vector<8x128xf32>
    %60 = arith.addf %58, %59 : vector<8x128xf32>
    %61 = math.tanh %60 : vector<8x128xf32>
    %62 = arith.mulf %57, %61 : vector<8x128xf32>
    %63 = arith.index_cast %c1_i32 : i32 to index
    %c0_24 = arith.constant 0 : index
    %c0_25 = arith.constant 0 : index
    %64 = vector.load %arg4[%63, %c0_24, %c0_25] : memref<8x8x128xf32, #tpu.memory_space<vmem>>, vector<1x8x128xf32>
    %65 = vector.shape_cast %64 : vector<1x8x128xf32> to vector<8x128xf32>
    %66 = vector.shape_cast %62 : vector<8x128xf32> to vector<1x8x128xf32>
    tpu.vector_store %arg4[%63, %c0_24, %c0_25], %66 {strides = array<i32>} : memref<8x8x128xf32, #tpu.memory_space<vmem>>, vector<1x8x128xf32>,
    %67 = arith.index_cast %c1_i32 : i32 to index
    %c0_26 = arith.constant 0 : index
    %c0_27 = arith.constant 0 : index
    %68 = vector.load %arg5[%67, %c0_26, %c0_27] : memref<8x8x128xf32, #tpu.memory_space<vmem>>, vector<1x8x128xf32>
    %69 = vector.shape_cast %68 : vector<1x8x128xf32> to vector<8x128xf32>
    %70 = vector.shape_cast %60 : vector<8x128xf32> to vector<1x8x128xf32>
    tpu.vector_store %arg5[%67, %c0_26, %c0_27], %70 {strides = array<i32>} : memref<8x8x128xf32, #tpu.memory_space<vmem>>, vector<1x8x128xf32>,
    %c2_i32 = arith.constant 2 : i32
    %71 = arith.index_cast %c2_i32 : i32 to index
    %c0_28 = arith.constant 0 : index
    %c0_29 = arith.constant 0 : index
    %72 = vector.load %arg2[%71, %c0_28, %c0_29] : memref<8x8x512xbf16, #tpu.memory_space<vmem>>, vector<1x8x512xbf16>
    %73 = vector.shape_cast %72 : vector<1x8x512xbf16> to vector<8x512xbf16>
    %74 = arith.extf %73 : vector<8x512xbf16> to vector<8x512xf32>
    %c0_30 = arith.constant 0 : index
    %c0_31 = arith.constant 0 : index
    %75 = vector.load %arg3[%c0_30, %c0_31] : memref<128x512xf32, #tpu.memory_space<vmem>>, vector<128x512xf32>
    %cst_32 = arith.constant dense<0.000000e+00> : vector<8x512xf32>
    %76 = tpu.matmul %62, %75, %cst_32 {dimension_numbers = #tpu.dot_dimension_numbers<[1], [0], [0], [1], [0, 0, 1, 1], [], []>} : vector<8x128xf32>, vector<128x512xf32>, vector<8x512xf32> -> vector<8x512xf32>
    %77 = arith.addf %74, %76 : vector<8x512xf32>
    %78 = vector.extract_strided_slice %77 {offsets = [0, 0], sizes = [8, 384], strides = [1, 1]} : vector<8x512xf32> to vector<8x384xf32>
    %cst_33 = arith.constant 5.000000e-01 : f32
    %79 = vector.broadcast %cst_33 : f32 to vector<8x384xf32>
    %80 = arith.mulf %79, %78 : vector<8x384xf32>
    %81 = math.tanh %80 : vector<8x384xf32>
    %cst_34 = arith.constant 5.000000e-01 : f32
    %82 = vector.broadcast %cst_34 : f32 to vector<8x384xf32>
    %83 = arith.mulf %82, %81 : vector<8x384xf32>
    %cst_35 = arith.constant 5.000000e-01 : f32
    %84 = vector.broadcast %cst_35 : f32 to vector<8x384xf32>
    %85 = arith.addf %83, %84 : vector<8x384xf32>
    %86 = vector.extract_strided_slice %77 {offsets = [0, 384], sizes = [8, 128], strides = [1, 1]} : vector<8x512xf32> to vector<8x128xf32>
    %87 = math.tanh %86 : vector<8x128xf32>
    %88 = vector.extract_strided_slice %85 {offsets = [0, 0], sizes = [8, 128], strides = [1, 1]} : vector<8x384xf32> to vector<8x128xf32>
    %89 = vector.extract_strided_slice %85 {offsets = [0, 128], sizes = [8, 128], strides = [1, 1]} : vector<8x384xf32> to vector<8x128xf32>
    %90 = vector.extract_strided_slice %85 {offsets = [0, 256], sizes = [8, 128], strides = [1, 1]} : vector<8x384xf32> to vector<8x128xf32>
    %91 = arith.mulf %89, %60 : vector<8x128xf32>
    %92 = arith.mulf %88, %87 : vector<8x128xf32>
    %93 = arith.addf %91, %92 : vector<8x128xf32>
    %94 = math.tanh %93 : vector<8x128xf32>
    %95 = arith.mulf %90, %94 : vector<8x128xf32>
    %96 = arith.index_cast %c2_i32 : i32 to index
    %c0_36 = arith.constant 0 : index
    %c0_37 = arith.constant 0 : index
    %97 = vector.load %arg4[%96, %c0_36, %c0_37] : memref<8x8x128xf32, #tpu.memory_space<vmem>>, vector<1x8x128xf32>
    %98 = vector.shape_cast %97 : vector<1x8x128xf32> to vector<8x128xf32>
    %99 = vector.shape_cast %95 : vector<8x128xf32> to vector<1x8x128xf32>
    tpu.vector_store %arg4[%96, %c0_36, %c0_37], %99 {strides = array<i32>} : memref<8x8x128xf32, #tpu.memory_space<vmem>>, vector<1x8x128xf32>,
    %100 = arith.index_cast %c2_i32 : i32 to index
    %c0_38 = arith.constant 0 : index
    %c0_39 = arith.constant 0 : index
    %101 = vector.load %arg5[%100, %c0_38, %c0_39] : memref<8x8x128xf32, #tpu.memory_space<vmem>>, vector<1x8x128xf32>
    %102 = vector.shape_cast %101 : vector<1x8x128xf32> to vector<8x128xf32>
    %103 = vector.shape_cast %93 : vector<8x128xf32> to vector<1x8x128xf32>
    tpu.vector_store %arg5[%100, %c0_38, %c0_39], %103 {strides = array<i32>} : memref<8x8x128xf32, #tpu.memory_space<vmem>>, vector<1x8x128xf32>,
    %c3_i32 = arith.constant 3 : i32
    %104 = arith.index_cast %c3_i32 : i32 to index
    %c0_40 = arith.constant 0 : index
    %c0_41 = arith.constant 0 : index
    %105 = vector.load %arg2[%104, %c0_40, %c0_41] : memref<8x8x512xbf16, #tpu.memory_space<vmem>>, vector<1x8x512xbf16>
    %106 = vector.shape_cast %105 : vector<1x8x512xbf16> to vector<8x512xbf16>
    %107 = arith.extf %106 : vector<8x512xbf16> to vector<8x512xf32>
    %c0_42 = arith.constant 0 : index
    %c0_43 = arith.constant 0 : index
    %108 = vector.load %arg3[%c0_42, %c0_43] : memref<128x512xf32, #tpu.memory_space<vmem>>, vector<128x512xf32>
    %cst_44 = arith.constant dense<0.000000e+00> : vector<8x512xf32>
    %109 = tpu.matmul %95, %108, %cst_44 {dimension_numbers = #tpu.dot_dimension_numbers<[1], [0], [0], [1], [0, 0, 1, 1], [], []>} : vector<8x128xf32>, vector<128x512xf32>, vector<8x512xf32> -> vector<8x512xf32>
    %110 = arith.addf %107, %109 : vector<8x512xf32>
    %111 = vector.extract_strided_slice %110 {offsets = [0, 0], sizes = [8, 384], strides = [1, 1]} : vector<8x512xf32> to vector<8x384xf32>
    %cst_45 = arith.constant 5.000000e-01 : f32
    %112 = vector.broadcast %cst_45 : f32 to vector<8x384xf32>
    %113 = arith.mulf %112, %111 : vector<8x384xf32>
    %114 = math.tanh %113 : vector<8x384xf32>
    %cst_46 = arith.constant 5.000000e-01 : f32
    %115 = vector.broadcast %cst_46 : f32 to vector<8x384xf32>
    %116 = arith.mulf %115, %114 : vector<8x384xf32>
    %cst_47 = arith.constant 5.000000e-01 : f32
    %117 = vector.broadcast %cst_47 : f32 to vector<8x384xf32>
    %118 = arith.addf %116, %117 : vector<8x384xf32>
    %119 = vector.extract_strided_slice %110 {offsets = [0, 384], sizes = [8, 128], strides = [1, 1]} : vector<8x512xf32> to vector<8x128xf32>
    %120 = math.tanh %119 : vector<8x128xf32>
    %121 = vector.extract_strided_slice %118 {offsets = [0, 0], sizes = [8, 128], strides = [1, 1]} : vector<8x384xf32> to vector<8x128xf32>
    %122 = vector.extract_strided_slice %118 {offsets = [0, 128], sizes = [8, 128], strides = [1, 1]} : vector<8x384xf32> to vector<8x128xf32>
    %123 = vector.extract_strided_slice %118 {offsets = [0, 256], sizes = [8, 128], strides = [1, 1]} : vector<8x384xf32> to vector<8x128xf32>
    %124 = arith.mulf %122, %93 : vector<8x128xf32>
    %125 = arith.mulf %121, %120 : vector<8x128xf32>
    %126 = arith.addf %124, %125 : vector<8x128xf32>
    %127 = math.tanh %126 : vector<8x128xf32>
    %128 = arith.mulf %123, %127 : vector<8x128xf32>
    %129 = arith.index_cast %c3_i32 : i32 to index
    %c0_48 = arith.constant 0 : index
    %c0_49 = arith.constant 0 : index
    %130 = vector.load %arg4[%129, %c0_48, %c0_49] : memref<8x8x128xf32, #tpu.memory_space<vmem>>, vector<1x8x128xf32>
    %131 = vector.shape_cast %130 : vector<1x8x128xf32> to vector<8x128xf32>
    %132 = vector.shape_cast %128 : vector<8x128xf32> to vector<1x8x128xf32>
    tpu.vector_store %arg4[%129, %c0_48, %c0_49], %132 {strides = array<i32>} : memref<8x8x128xf32, #tpu.memory_space<vmem>>, vector<1x8x128xf32>,
    %133 = arith.index_cast %c3_i32 : i32 to index
    %c0_50 = arith.constant 0 : index
    %c0_51 = arith.constant 0 : index
    %134 = vector.load %arg5[%133, %c0_50, %c0_51] : memref<8x8x128xf32, #tpu.memory_space<vmem>>, vector<1x8x128xf32>
    %135 = vector.shape_cast %134 : vector<1x8x128xf32> to vector<8x128xf32>
    %136 = vector.shape_cast %126 : vector<8x128xf32> to vector<1x8x128xf32>
    tpu.vector_store %arg5[%133, %c0_50, %c0_51], %136 {strides = array<i32>} : memref<8x8x128xf32, #tpu.memory_space<vmem>>, vector<1x8x128xf32>,
    %c4_i32 = arith.constant 4 : i32
    %137 = arith.index_cast %c4_i32 : i32 to index
    %c0_52 = arith.constant 0 : index
    %c0_53 = arith.constant 0 : index
    %138 = vector.load %arg2[%137, %c0_52, %c0_53] : memref<8x8x512xbf16, #tpu.memory_space<vmem>>, vector<1x8x512xbf16>
    %139 = vector.shape_cast %138 : vector<1x8x512xbf16> to vector<8x512xbf16>
    %140 = arith.extf %139 : vector<8x512xbf16> to vector<8x512xf32>
    %c0_54 = arith.constant 0 : index
    %c0_55 = arith.constant 0 : index
    %141 = vector.load %arg3[%c0_54, %c0_55] : memref<128x512xf32, #tpu.memory_space<vmem>>, vector<128x512xf32>
    %cst_56 = arith.constant dense<0.000000e+00> : vector<8x512xf32>
    %142 = tpu.matmul %128, %141, %cst_56 {dimension_numbers = #tpu.dot_dimension_numbers<[1], [0], [0], [1], [0, 0, 1, 1], [], []>} : vector<8x128xf32>, vector<128x512xf32>, vector<8x512xf32> -> vector<8x512xf32>
    %143 = arith.addf %140, %142 : vector<8x512xf32>
    %144 = vector.extract_strided_slice %143 {offsets = [0, 0], sizes = [8, 384], strides = [1, 1]} : vector<8x512xf32> to vector<8x384xf32>
    %cst_57 = arith.constant 5.000000e-01 : f32
    %145 = vector.broadcast %cst_57 : f32 to vector<8x384xf32>
    %146 = arith.mulf %145, %144 : vector<8x384xf32>
    %147 = math.tanh %146 : vector<8x384xf32>
    %cst_58 = arith.constant 5.000000e-01 : f32
    %148 = vector.broadcast %cst_58 : f32 to vector<8x384xf32>
    %149 = arith.mulf %148, %147 : vector<8x384xf32>
    %cst_59 = arith.constant 5.000000e-01 : f32
    %150 = vector.broadcast %cst_59 : f32 to vector<8x384xf32>
    %151 = arith.addf %149, %150 : vector<8x384xf32>
    %152 = vector.extract_strided_slice %143 {offsets = [0, 384], sizes = [8, 128], strides = [1, 1]} : vector<8x512xf32> to vector<8x128xf32>
    %153 = math.tanh %152 : vector<8x128xf32>
    %154 = vector.extract_strided_slice %151 {offsets = [0, 0], sizes = [8, 128], strides = [1, 1]} : vector<8x384xf32> to vector<8x128xf32>
    %155 = vector.extract_strided_slice %151 {offsets = [0, 128], sizes = [8, 128], strides = [1, 1]} : vector<8x384xf32> to vector<8x128xf32>
    %156 = vector.extract_strided_slice %151 {offsets = [0, 256], sizes = [8, 128], strides = [1, 1]} : vector<8x384xf32> to vector<8x128xf32>
    %157 = arith.mulf %155, %126 : vector<8x128xf32>
    %158 = arith.mulf %154, %153 : vector<8x128xf32>
    %159 = arith.addf %157, %158 : vector<8x128xf32>
    %160 = math.tanh %159 : vector<8x128xf32>
    %161 = arith.mulf %156, %160 : vector<8x128xf32>
    %162 = arith.index_cast %c4_i32 : i32 to index
    %c0_60 = arith.constant 0 : index
    %c0_61 = arith.constant 0 : index
    %163 = vector.load %arg4[%162, %c0_60, %c0_61] : memref<8x8x128xf32, #tpu.memory_space<vmem>>, vector<1x8x128xf32>
    %164 = vector.shape_cast %163 : vector<1x8x128xf32> to vector<8x128xf32>
    %165 = vector.shape_cast %161 : vector<8x128xf32> to vector<1x8x128xf32>
    tpu.vector_store %arg4[%162, %c0_60, %c0_61], %165 {strides = array<i32>} : memref<8x8x128xf32, #tpu.memory_space<vmem>>, vector<1x8x128xf32>,
    %166 = arith.index_cast %c4_i32 : i32 to index
    %c0_62 = arith.constant 0 : index
    %c0_63 = arith.constant 0 : index
    %167 = vector.load %arg5[%166, %c0_62, %c0_63] : memref<8x8x128xf32, #tpu.memory_space<vmem>>, vector<1x8x128xf32>
    %168 = vector.shape_cast %167 : vector<1x8x128xf32> to vector<8x128xf32>
    %169 = vector.shape_cast %159 : vector<8x128xf32> to vector<1x8x128xf32>
    tpu.vector_store %arg5[%166, %c0_62, %c0_63], %169 {strides = array<i32>} : memref<8x8x128xf32, #tpu.memory_space<vmem>>, vector<1x8x128xf32>,
    %c5_i32 = arith.constant 5 : i32
    %170 = arith.index_cast %c5_i32 : i32 to index
    %c0_64 = arith.constant 0 : index
    %c0_65 = arith.constant 0 : index
    %171 = vector.load %arg2[%170, %c0_64, %c0_65] : memref<8x8x512xbf16, #tpu.memory_space<vmem>>, vector<1x8x512xbf16>
    %172 = vector.shape_cast %171 : vector<1x8x512xbf16> to vector<8x512xbf16>
    %173 = arith.extf %172 : vector<8x512xbf16> to vector<8x512xf32>
    %c0_66 = arith.constant 0 : index
    %c0_67 = arith.constant 0 : index
    %174 = vector.load %arg3[%c0_66, %c0_67] : memref<128x512xf32, #tpu.memory_space<vmem>>, vector<128x512xf32>
    %cst_68 = arith.constant dense<0.000000e+00> : vector<8x512xf32>
    %175 = tpu.matmul %161, %174, %cst_68 {dimension_numbers = #tpu.dot_dimension_numbers<[1], [0], [0], [1], [0, 0, 1, 1], [], []>} : vector<8x128xf32>, vector<128x512xf32>, vector<8x512xf32> -> vector<8x512xf32>
    %176 = arith.addf %173, %175 : vector<8x512xf32>
    %177 = vector.extract_strided_slice %176 {offsets = [0, 0], sizes = [8, 384], strides = [1, 1]} : vector<8x512xf32> to vector<8x384xf32>
    %cst_69 = arith.constant 5.000000e-01 : f32
    %178 = vector.broadcast %cst_69 : f32 to vector<8x384xf32>
    %179 = arith.mulf %178, %177 : vector<8x384xf32>
    %180 = math.tanh %179 : vector<8x384xf32>
    %cst_70 = arith.constant 5.000000e-01 : f32
    %181 = vector.broadcast %cst_70 : f32 to vector<8x384xf32>
    %182 = arith.mulf %181, %180 : vector<8x384xf32>
    %cst_71 = arith.constant 5.000000e-01 : f32
    %183 = vector.broadcast %cst_71 : f32 to vector<8x384xf32>
    %184 = arith.addf %182, %183 : vector<8x384xf32>
    %185 = vector.extract_strided_slice %176 {offsets = [0, 384], sizes = [8, 128], strides = [1, 1]} : vector<8x512xf32> to vector<8x128xf32>
    %186 = math.tanh %185 : vector<8x128xf32>
    %187 = vector.extract_strided_slice %184 {offsets = [0, 0], sizes = [8, 128], strides = [1, 1]} : vector<8x384xf32> to vector<8x128xf32>
    %188 = vector.extract_strided_slice %184 {offsets = [0, 128], sizes = [8, 128], strides = [1, 1]} : vector<8x384xf32> to vector<8x128xf32>
    %189 = vector.extract_strided_slice %184 {offsets = [0, 256], sizes = [8, 128], strides = [1, 1]} : vector<8x384xf32> to vector<8x128xf32>
    %190 = arith.mulf %188, %159 : vector<8x128xf32>
    %191 = arith.mulf %187, %186 : vector<8x128xf32>
    %192 = arith.addf %190, %191 : vector<8x128xf32>
    %193 = math.tanh %192 : vector<8x128xf32>
    %194 = arith.mulf %189, %193 : vector<8x128xf32>
    %195 = arith.index_cast %c5_i32 : i32 to index
    %c0_72 = arith.constant 0 : index
    %c0_73 = arith.constant 0 : index
    %196 = vector.load %arg4[%195, %c0_72, %c0_73] : memref<8x8x128xf32, #tpu.memory_space<vmem>>, vector<1x8x128xf32>
    %197 = vector.shape_cast %196 : vector<1x8x128xf32> to vector<8x128xf32>
    %198 = vector.shape_cast %194 : vector<8x128xf32> to vector<1x8x128xf32>
    tpu.vector_store %arg4[%195, %c0_72, %c0_73], %198 {strides = array<i32>} : memref<8x8x128xf32, #tpu.memory_space<vmem>>, vector<1x8x128xf32>,
    %199 = arith.index_cast %c5_i32 : i32 to index
    %c0_74 = arith.constant 0 : index
    %c0_75 = arith.constant 0 : index
    %200 = vector.load %arg5[%199, %c0_74, %c0_75] : memref<8x8x128xf32, #tpu.memory_space<vmem>>, vector<1x8x128xf32>
    %201 = vector.shape_cast %200 : vector<1x8x128xf32> to vector<8x128xf32>
    %202 = vector.shape_cast %192 : vector<8x128xf32> to vector<1x8x128xf32>
    tpu.vector_store %arg5[%199, %c0_74, %c0_75], %202 {strides = array<i32>} : memref<8x8x128xf32, #tpu.memory_space<vmem>>, vector<1x8x128xf32>,
    %c6_i32 = arith.constant 6 : i32
    %203 = arith.index_cast %c6_i32 : i32 to index
    %c0_76 = arith.constant 0 : index
    %c0_77 = arith.constant 0 : index
    %204 = vector.load %arg2[%203, %c0_76, %c0_77] : memref<8x8x512xbf16, #tpu.memory_space<vmem>>, vector<1x8x512xbf16>
    %205 = vector.shape_cast %204 : vector<1x8x512xbf16> to vector<8x512xbf16>
    %206 = arith.extf %205 : vector<8x512xbf16> to vector<8x512xf32>
    %c0_78 = arith.constant 0 : index
    %c0_79 = arith.constant 0 : index
    %207 = vector.load %arg3[%c0_78, %c0_79] : memref<128x512xf32, #tpu.memory_space<vmem>>, vector<128x512xf32>
    %cst_80 = arith.constant dense<0.000000e+00> : vector<8x512xf32>
    %208 = tpu.matmul %194, %207, %cst_80 {dimension_numbers = #tpu.dot_dimension_numbers<[1], [0], [0], [1], [0, 0, 1, 1], [], []>} : vector<8x128xf32>, vector<128x512xf32>, vector<8x512xf32> -> vector<8x512xf32>
    %209 = arith.addf %206, %208 : vector<8x512xf32>
    %210 = vector.extract_strided_slice %209 {offsets = [0, 0], sizes = [8, 384], strides = [1, 1]} : vector<8x512xf32> to vector<8x384xf32>
    %cst_81 = arith.constant 5.000000e-01 : f32
    %211 = vector.broadcast %cst_81 : f32 to vector<8x384xf32>
    %212 = arith.mulf %211, %210 : vector<8x384xf32>
    %213 = math.tanh %212 : vector<8x384xf32>
    %cst_82 = arith.constant 5.000000e-01 : f32
    %214 = vector.broadcast %cst_82 : f32 to vector<8x384xf32>
    %215 = arith.mulf %214, %213 : vector<8x384xf32>
    %cst_83 = arith.constant 5.000000e-01 : f32
    %216 = vector.broadcast %cst_83 : f32 to vector<8x384xf32>
    %217 = arith.addf %215, %216 : vector<8x384xf32>
    %218 = vector.extract_strided_slice %209 {offsets = [0, 384], sizes = [8, 128], strides = [1, 1]} : vector<8x512xf32> to vector<8x128xf32>
    %219 = math.tanh %218 : vector<8x128xf32>
    %220 = vector.extract_strided_slice %217 {offsets = [0, 0], sizes = [8, 128], strides = [1, 1]} : vector<8x384xf32> to vector<8x128xf32>
    %221 = vector.extract_strided_slice %217 {offsets = [0, 128], sizes = [8, 128], strides = [1, 1]} : vector<8x384xf32> to vector<8x128xf32>
    %222 = vector.extract_strided_slice %217 {offsets = [0, 256], sizes = [8, 128], strides = [1, 1]} : vector<8x384xf32> to vector<8x128xf32>
    %223 = arith.mulf %221, %192 : vector<8x128xf32>
    %224 = arith.mulf %220, %219 : vector<8x128xf32>
    %225 = arith.addf %223, %224 : vector<8x128xf32>
    %226 = math.tanh %225 : vector<8x128xf32>
    %227 = arith.mulf %222, %226 : vector<8x128xf32>
    %228 = arith.index_cast %c6_i32 : i32 to index
    %c0_84 = arith.constant 0 : index
    %c0_85 = arith.constant 0 : index
    %229 = vector.load %arg4[%228, %c0_84, %c0_85] : memref<8x8x128xf32, #tpu.memory_space<vmem>>, vector<1x8x128xf32>
    %230 = vector.shape_cast %229 : vector<1x8x128xf32> to vector<8x128xf32>
    %231 = vector.shape_cast %227 : vector<8x128xf32> to vector<1x8x128xf32>
    tpu.vector_store %arg4[%228, %c0_84, %c0_85], %231 {strides = array<i32>} : memref<8x8x128xf32, #tpu.memory_space<vmem>>, vector<1x8x128xf32>,
    %232 = arith.index_cast %c6_i32 : i32 to index
    %c0_86 = arith.constant 0 : index
    %c0_87 = arith.constant 0 : index
    %233 = vector.load %arg5[%232, %c0_86, %c0_87] : memref<8x8x128xf32, #tpu.memory_space<vmem>>, vector<1x8x128xf32>
    %234 = vector.shape_cast %233 : vector<1x8x128xf32> to vector<8x128xf32>
    %235 = vector.shape_cast %225 : vector<8x128xf32> to vector<1x8x128xf32>
    tpu.vector_store %arg5[%232, %c0_86, %c0_87], %235 {strides = array<i32>} : memref<8x8x128xf32, #tpu.memory_space<vmem>>, vector<1x8x128xf32>,
    %c7_i32 = arith.constant 7 : i32
    %236 = arith.index_cast %c7_i32 : i32 to index
    %c0_88 = arith.constant 0 : index
    %c0_89 = arith.constant 0 : index
    %237 = vector.load %arg2[%236, %c0_88, %c0_89] : memref<8x8x512xbf16, #tpu.memory_space<vmem>>, vector<1x8x512xbf16>
    %238 = vector.shape_cast %237 : vector<1x8x512xbf16> to vector<8x512xbf16>
    %239 = arith.extf %238 : vector<8x512xbf16> to vector<8x512xf32>
    %c0_90 = arith.constant 0 : index
    %c0_91 = arith.constant 0 : index
    %240 = vector.load %arg3[%c0_90, %c0_91] : memref<128x512xf32, #tpu.memory_space<vmem>>, vector<128x512xf32>
    %cst_92 = arith.constant dense<0.000000e+00> : vector<8x512xf32>
    %241 = tpu.matmul %227, %240, %cst_92 {dimension_numbers = #tpu.dot_dimension_numbers<[1], [0], [0], [1], [0, 0, 1, 1], [], []>} : vector<8x128xf32>, vector<128x512xf32>, vector<8x512xf32> -> vector<8x512xf32>
    %242 = arith.addf %239, %241 : vector<8x512xf32>
    %243 = vector.extract_strided_slice %242 {offsets = [0, 0], sizes = [8, 384], strides = [1, 1]} : vector<8x512xf32> to vector<8x384xf32>
    %cst_93 = arith.constant 5.000000e-01 : f32
    %244 = vector.broadcast %cst_93 : f32 to vector<8x384xf32>
    %245 = arith.mulf %244, %243 : vector<8x384xf32>
    %246 = math.tanh %245 : vector<8x384xf32>
    %cst_94 = arith.constant 5.000000e-01 : f32
    %247 = vector.broadcast %cst_94 : f32 to vector<8x384xf32>
    %248 = arith.mulf %247, %246 : vector<8x384xf32>
    %cst_95 = arith.constant 5.000000e-01 : f32
    %249 = vector.broadcast %cst_95 : f32 to vector<8x384xf32>
    %250 = arith.addf %248, %249 : vector<8x384xf32>
    %251 = vector.extract_strided_slice %242 {offsets = [0, 384], sizes = [8, 128], strides = [1, 1]} : vector<8x512xf32> to vector<8x128xf32>
    %252 = math.tanh %251 : vector<8x128xf32>
    %253 = vector.extract_strided_slice %250 {offsets = [0, 0], sizes = [8, 128], strides = [1, 1]} : vector<8x384xf32> to vector<8x128xf32>
    %254 = vector.extract_strided_slice %250 {offsets = [0, 128], sizes = [8, 128], strides = [1, 1]} : vector<8x384xf32> to vector<8x128xf32>
    %255 = vector.extract_strided_slice %250 {offsets = [0, 256], sizes = [8, 128], strides = [1, 1]} : vector<8x384xf32> to vector<8x128xf32>
    %256 = arith.mulf %254, %225 : vector<8x128xf32>
    %257 = arith.mulf %253, %252 : vector<8x128xf32>
    %258 = arith.addf %256, %257 : vector<8x128xf32>
    %259 = math.tanh %258 : vector<8x128xf32>
    %260 = arith.mulf %255, %259 : vector<8x128xf32>
    %261 = arith.index_cast %c7_i32 : i32 to index
    %c0_96 = arith.constant 0 : index
    %c0_97 = arith.constant 0 : index
    %262 = vector.load %arg4[%261, %c0_96, %c0_97] : memref<8x8x128xf32, #tpu.memory_space<vmem>>, vector<1x8x128xf32>
    %263 = vector.shape_cast %262 : vector<1x8x128xf32> to vector<8x128xf32>
    %264 = vector.shape_cast %260 : vector<8x128xf32> to vector<1x8x128xf32>
    tpu.vector_store %arg4[%261, %c0_96, %c0_97], %264 {strides = array<i32>} : memref<8x8x128xf32, #tpu.memory_space<vmem>>, vector<1x8x128xf32>,
    %265 = arith.index_cast %c7_i32 : i32 to index
    %c0_98 = arith.constant 0 : index
    %c0_99 = arith.constant 0 : index
    %266 = vector.load %arg5[%265, %c0_98, %c0_99] : memref<8x8x128xf32, #tpu.memory_space<vmem>>, vector<1x8x128xf32>
    %267 = vector.shape_cast %266 : vector<1x8x128xf32> to vector<8x128xf32>
    %268 = vector.shape_cast %258 : vector<8x128xf32> to vector<1x8x128xf32>
    tpu.vector_store %arg5[%265, %c0_98, %c0_99], %268 {strides = array<i32>} : memref<8x8x128xf32, #tpu.memory_space<vmem>>, vector<1x8x128xf32>,
    %c8_i32 = arith.constant 8 : i32
    %c0_100 = arith.constant 0 : index
    %c0_101 = arith.constant 0 : index
    %269 = vector.load %arg6[%c0_100, %c0_101] : memref<8x128xf32, #tpu.memory_space<vmem>>, vector<8x128xf32>
    tpu.vector_store %arg6[%c0_100, %c0_101], %260 {strides = array<i32>} : memref<8x128xf32, #tpu.memory_space<vmem>>, vector<8x128xf32>,
    %c0_102 = arith.constant 0 : index
    %c0_103 = arith.constant 0 : index
    %270 = vector.load %arg7[%c0_102, %c0_103] : memref<8x128xf32, #tpu.memory_space<vmem>>, vector<8x128xf32>
    tpu.vector_store %arg7[%c0_102, %c0_103], %258 {strides = array<i32>} : memref<8x128xf32, #tpu.memory_space<vmem>>, vector<8x128xf32>,
    return
  }
  func.func @transform_0(%arg0: i32, %arg1: i32) -> (i32, i32, i32) {
    %c0_i32 = arith.constant 0 : i32
    %c0_i32_0 = arith.constant 0 : i32
    return %arg1, %arg0, %c0_i32 : i32, i32, i32
  }
  func.func @transform_1(%arg0: i32, %arg1: i32) -> (i32, i32) {
    %c0_i32 = arith.constant 0 : i32
    %c0_i32_0 = arith.constant 0 : i32
    %c0_i32_1 = arith.constant 0 : i32
    return %c0_i32, %c0_i32_0 : i32, i32
  }
  func.func @transform_2(%arg0: i32, %arg1: i32) -> (i32, i32, i32) {
    %c0_i32 = arith.constant 0 : i32
    %c0_i32_0 = arith.constant 0 : i32
    return %arg1, %arg0, %c0_i32 : i32, i32, i32
  }
  func.func @transform_3(%arg0: i32, %arg1: i32) -> (i32, i32, i32) {
    %c0_i32 = arith.constant 0 : i32
    %c0_i32_0 = arith.constant 0 : i32
    return %arg1, %arg0, %c0_i32 : i32, i32, i32
  }
}

</mosaic_0001>

<bundles_post_ra>
// kernel: tpu_custom_call.1
= control target key start
LH: loop header
LB: loop body
LE: loop exit
PB: predicated region body
PF: predicated region fallthrough
CT: control target
= control target key end

     0   :  { %9 = vsyncpa [#allocation5], 0  ;;  %s3206_s0 = inlined_call_operand.hbm [shape: bf16[8,8,512], index: 0, kind: input, shape index: {}]   ;;  %s3207_s1 = inlined_call_operand.hbm [shape: f32[128,512], index: 1, kind: input, shape index: {}]   ;;  %s3208_s2 = inlined_call_operand.hbm [shape: f32[8,8,128], index: 2, kind: output, shape index: {0}]   ;;  %s3209_s3 = inlined_call_operand.hbm [shape: f32[8,8,128], index: 3, kind: output, shape index: {1}]  }
   0x1   :  { %10 = vsyncpa [#allocation8], 0 }
   0x2   :  { %11 = vsyncpa [#allocation6], 0 }
   0x3   :  { %12 = vsyncpa [#allocation11], 0  ;;  %s2695_s12 = smov [#allocation4]   ;;  %s2599_s16 = scalar_lea.hbm %s3206_s0, 2048 }
   0x4   :  { %s18_s13 = sshll.u32 %s2695_s12, 4  ;;  %p2600_p0 = scmp.ne.s32.totalorder %s3206_s0, %s2599_s16  ;;  %s19_s13 = int_to_ptr.vmem [resolvable:$true] %s18_s13 }
   0x5   :  { %p2603_p1 = scmp.lt.u32.totalorder %s2599_s16, %s3206_s0 }
   0x7   :  { %p2605_p2 = pnand %p2603_p1, %p2600_p0 }
   0x9   :  { %2608 = shalt.err (!%p2605_p2)
}
   0xa   :  { %s2609_s21 = scalar_lea.vmem %s19_s13, 2048  ;;  %p2614_p4 = scmp.lt.s32.totalorder %s19_s13, %s19_s13 }
   0xb   :  { %p2610_p3 = scmp.ne.s32.totalorder %s19_s13, %s2609_s21  ;;  %p2615_p5 = scmp.lt.s32.totalorder %s2609_s21, %s2609_s21 }
   0xd   :  { %p2616_p6 = por %p2615_p5, %p2614_p4 }
   0xf   :  { %p2617_p7 = pnand %p2616_p6, %p2610_p3 }
  0x11   :  { %2620 = shalt.err (!%p2617_p7)
}
  0x12   :  { %s2696_s22 = smov 256   ;;  %s2697_s23 = smov 16  }
  0x13   :  { %24 = dma.hbm_to_vmem [thread:$0]  %s3206_s0, 2048, %s19_s13, [#allocation5], %s2696_s22, %s2696_s22, %s2697_s23  }
  0x14   :  { %s2698_s26 = smov [#allocation7]   ;;  %s2621_s30 = scalar_lea.hbm %s3207_s1, 8192 }
  0x15   :  { %s30_s27 = sshll.u32 %s2698_s26, 4  ;;  %p2622_p8 = scmp.ne.s32.totalorder %s3207_s1, %s2621_s30  ;;  %s31_s27 = int_to_ptr.vmem [resolvable:$true] %s30_s27 }
  0x16   :  { %p2625_p9 = scmp.lt.u32.totalorder %s2621_s30, %s3207_s1 }
  0x18   :  { %p2627_p10 = pnand %p2625_p9, %p2622_p8 }
  0x1a   :  { %2630 = shalt.err (!%p2627_p10)
}
  0x1b   :  { %s2631_s8 = scalar_lea.vmem %s31_s27, 8192  ;;  %p2636_p12 = scmp.lt.s32.totalorder %s31_s27, %s31_s27 }
  0x1c   :  { %p2632_p11 = scmp.ne.s32.totalorder %s31_s27, %s2631_s8  ;;  %p2637_p13 = scmp.lt.s32.totalorder %s2631_s8, %s2631_s8 }
  0x1e   :  { %p2638_p0 = por %p2637_p13, %p2636_p12 }
  0x20   :  { %p2639_p1 = pnand %p2638_p0, %p2632_p11 }
  0x22   :  { %2642 = shalt.err (!%p2639_p1)
}
  0x23   :  { %s2699_s0 = smov 512   ;;  %s2700_s9 = smov 32  }
  0x24   :  { %36 = dma.hbm_to_vmem [thread:$0]  %s3207_s1, 8192, %s31_s27, [#allocation8], %s2699_s0, %s2699_s0, %s2700_s9  }
  0x25   :  { %2687 = dma.done.wait [#allocation5], 2048  }
  0x26   :  { %2688 = vsyncadd [#allocation5], 4294965248 }
  0x27   :  { %2689 = dma.done.wait [#allocation8], 8192  }
  0x28   :  { %2690 = vsyncadd [#allocation8], 4294959104  ;;  %v2701_v0 = vmov 0.0   ;;  %v58_v1 = vld [vmem:[#allocation7 + $0x8] sm:$0xff]  ;;  %v57_v3 = vld [vmem:[#allocation7] sm:$0xff]  ;;  %s2702_s1 = smov [#allocation10]  }
  0x29   :  { %185 = vmatprep.mubr.f32.mxu0 %v2701_v0  ;;  %256 = vmatprep.mubr.f32.mxu1 %v2701_v0  ;;  %v62_v2 = vld [vmem:[#allocation7 + $0x28] sm:$0xff]  ;;  %v61_v5 = vld [vmem:[#allocation7 + $0x20] sm:$0xff]  ;;  %v60_v12 = vld [vmem:[#allocation7 + $0x18] sm:$0xff]  ;;  %s1979_s12 = sshll.u32 %s2702_s1, 4  ;;  %s1980_s12 = int_to_ptr.vmem [resolvable:$true] %s1979_s12 }
  0x2a   :  { %v2752_v4 = vpack.c.bf16 %v62_v2, %v58_v1  ;;  %v66_v6 = vld [vmem:[#allocation7 + $0x48] sm:$0xff]  ;;  %v2754_v8 = vpack.c.bf16 %v61_v5, %v57_v3  ;;  %v65_v10 = vld [vmem:[#allocation7 + $0x40] sm:$0xff]  ;;  %v64_v13 = vld [vmem:[#allocation7 + $0x38] sm:$0xff]  ;;  %s2643_s13 = scalar_lea.vmem %s1980_s12, 1024  ;;  %p2648_p3 = scmp.lt.s32.totalorder %s1980_s12, %s1980_s12 }
  0x2b   :  { %v70_v7 = vld [vmem:[#allocation7 + $0x68] sm:$0xff]  ;;  %v69_v11 = vld [vmem:[#allocation7 + $0x60] sm:$0xff]  ;;  %v59_v14 = vld [vmem:[#allocation7 + $0x10] sm:$0xff]  ;;  %v2762_v17 = vpack.c.bf16 %v64_v13, %v60_v12  ;;  %p2644_p2 = scmp.ne.s32.totalorder %s1980_s12, %s2643_s13  ;;  %p2649_p4 = scmp.lt.s32.totalorder %s2643_s13, %s2643_s13 }
  0x2c   :  { %v2756_v9 = vpack.c.bf16 %v70_v7, %v66_v6  ;;  %1997 = vmatprep.subr.bf16.mxu0 %v2752_v4  ;;  %v63_v15 = vld [vmem:[#allocation7 + $0x30] sm:$0xff]  ;;  %v2760_v16 = vpack.c.bf16 %v69_v11, %v65_v10  ;;  %v74_v19 = vld [vmem:[#allocation7 + $0x88] sm:$0xff]  ;;  %v73_v21 = vld [vmem:[#allocation7 + $0x80] sm:$0xff] }
  0x2d   :  { %1999 = vmatpush1.bf16.msra.mxu0 %v2754_v8  ;;  %v2764_v18 = vpack.c.bf16 %v63_v15, %v59_v14  ;;  %v78_v20 = vld [vmem:[#allocation7 + $0xa8] sm:$0xff]  ;;  %v77_v23 = vld [vmem:[#allocation7 + $0xa0] sm:$0xff]  ;;  %v68_v24 = vld [vmem:[#allocation7 + $0x58] sm:$0xff]  ;;  %2029 = vmatprep.subr.bf16.mxu1 %v2762_v17  ;;  %p2650_p5 = por %p2649_p4, %p2648_p3 }
  0x2e   :  { %2001 = vmatprep.subr.bf16.mxu0 %v2756_v9  ;;  %v2767_v22 = vpack.c.bf16 %v78_v20, %v74_v19  ;;  %v72_v25 = vld [vmem:[#allocation7 + $0x78] sm:$0xff]  ;;  %v67_v27 = vld [vmem:[#allocation7 + $0x50] sm:$0xff]  ;;  %v82_v29 = vld [vmem:[#allocation7 + $0xc8] sm:$0xff]  ;;  %v2776_v32 = vpack.c.bf16 %v77_v23, %v73_v21 }
  0x2f   :  { %v2770_v26 = vpack.c.bf16 %v72_v25, %v68_v24  ;;  %v71_v28 = vld [vmem:[#allocation7 + $0x70] sm:$0xff]  ;;  %2031 = vmatpush1.bf16.msra.mxu1 %v2764_v18  ;;  %v86_v31 = vld [vmem:[#allocation7 + $0xe8] sm:$0xff]  ;;  %v76_v33 = vld [vmem:[#allocation7 + $0x98] sm:$0xff]  ;;  %p2651_p6 = pnand %p2650_p5, %p2644_p2 }
  0x30   :  { %v2773_v30 = vpack.c.bf16 %v71_v28, %v67_v27  ;;  %v80_v34 = vld [vmem:[#allocation7 + $0xb8] sm:$0xff]  ;;  %v75_v35 = vld [vmem:[#allocation7 + $0x90] sm:$0xff]  ;;  %v2780_v36 = vpack.c.bf16 %v86_v31, %v82_v29  ;;  %v81_v37 = vld [vmem:[#allocation7 + $0xc0] sm:$0xff] }
  0x31   :  { %2003 = vmatpush1.bf16.msra.mxu0 %v2760_v16  ;;  %2033 = vmatprep.subr.bf16.mxu1 %v2770_v26  ;;  %v85_v38 = vld [vmem:[#allocation7 + $0xe0] sm:$0xff]  ;;  %v2782_v39 = vpack.c.bf16 %v80_v34, %v76_v33  ;;  %v79_v40 = vld [vmem:[#allocation7 + $0xb0] sm:$0xff]  ;;  %v90_v41 = vld [vmem:[#allocation7 + $0x108] sm:$0xff] }
  0x32   :  { %2005 = vmatprep.subr.bf16.mxu0 %v2767_v22  ;;  %v94_v42 = vld [vmem:[#allocation7 + $0x128] sm:$0xff]  ;;  %v84_v43 = vld [vmem:[#allocation7 + $0xd8] sm:$0xff]  ;;  %v2785_v44 = vpack.c.bf16 %v79_v40, %v75_v35  ;;  %v2788_v46 = vpack.c.bf16 %v85_v38, %v81_v37  ;;  %v89_v47 = vld [vmem:[#allocation7 + $0x100] sm:$0xff] }
  0x33   :  { %2035 = vmatpush1.bf16.msra.mxu1 %v2773_v30  ;;  %v88_v45 = vld [vmem:[#allocation7 + $0xf8] sm:$0xff]  ;;  %v83_v49 = vld [vmem:[#allocation7 + $0xd0] sm:$0xff]  ;;  %v2794_v51 = vpack.c.bf16 %v94_v42, %v90_v41  ;;  %v93_v52 = vld [vmem:[#allocation7 + $0x120] sm:$0xff] }
  0x34   :  { %2037 = vmatprep.subr.bf16.mxu1 %v2782_v39  ;;  %v2791_v48 = vpack.c.bf16 %v88_v45, %v84_v43  ;;  %v87_v50 = vld [vmem:[#allocation7 + $0xf0] sm:$0xff]  ;;  %v92_v53 = vld [vmem:[#allocation7 + $0x118] sm:$0xff]  ;;  %v98_v55 = vld [vmem:[#allocation7 + $0x148] sm:$0xff]  ;;  %v2800_v58 = vpack.c.bf16 %v93_v52, %v89_v47 }
  0x35   :  { %2007 = vmatpush1.bf16.msra.mxu0 %v2776_v32  ;;  %v96_v54 = vld [vmem:[#allocation7 + $0x138] sm:$0xff]  ;;  %v102_v56 = vld [vmem:[#allocation7 + $0x168] sm:$0xff]  ;;  %v2797_v57 = vpack.c.bf16 %v87_v50, %v83_v49  ;;  %v97_v59 = vld [vmem:[#allocation7 + $0x140] sm:$0xff] }
  0x36   :  { %2009 = vmatprep.subr.bf16.mxu0 %v2780_v36  ;;  %v2803_v60 = vpack.c.bf16 %v96_v54, %v92_v53  ;;  %v91_v61 = vld [vmem:[#allocation7 + $0x110] sm:$0xff]  ;;  %v2806_v63 = vpack.c.bf16 %v102_v56, %v98_v55  ;;  %v101_v1 = vld [vmem:[#allocation7 + $0x160] sm:$0xff]  ;;  %v100_v2 = vld [vmem:[#allocation7 + $0x158] sm:$0xff] }
  0x37   :  { %2039 = vmatpush1.bf16.msra.mxu1 %v2785_v44  ;;  %v95_v62 = vld [vmem:[#allocation7 + $0x130] sm:$0xff]  ;;  %v104_v3 = vld [vmem:[#allocation7 + $0x178] sm:$0xff]  ;;  %v106_v5 = vld [vmem:[#allocation7 + $0x188] sm:$0xff]  ;;  %v2812_v10 = vpack.c.bf16 %v101_v1, %v97_v59 }
  0x38   :  { %2041 = vmatprep.subr.bf16.mxu1 %v2791_v48  ;;  %v110_v6 = vld [vmem:[#allocation7 + $0x1a8] sm:$0xff]  ;;  %v2809_v7 = vpack.c.bf16 %v95_v62, %v91_v61  ;;  %v105_v11 = vld [vmem:[#allocation7 + $0x180] sm:$0xff]  ;;  %v2815_v12 = vpack.c.bf16 %v104_v3, %v100_v2  ;;  %v99_v13 = vld [vmem:[#allocation7 + $0x150] sm:$0xff] }
  0x39   :  { %2011 = vmatpush1.bf16.msra.mxu0 %v2788_v46  ;;  %v103_v14 = vld [vmem:[#allocation7 + $0x170] sm:$0xff]  ;;  %v2818_v15 = vpack.c.bf16 %v110_v6, %v106_v5  ;;  %v109_v19 = vld [vmem:[#allocation7 + $0x1a0] sm:$0xff]  ;;  %v108_v20 = vld [vmem:[#allocation7 + $0x198] sm:$0xff] }
  0x3a   :  { %2013 = vmatprep.subr.bf16.mxu0 %v2794_v51  ;;  %v112_v21 = vld [vmem:[#allocation7 + $0x1b8] sm:$0xff]  ;;  %v114_v23 = vld [vmem:[#allocation7 + $0x1c8] sm:$0xff]  ;;  %v2821_v25 = vpack.c.bf16 %v103_v14, %v99_v13  ;;  %v2824_v27 = vpack.c.bf16 %v109_v19, %v105_v11  ;;  %v113_v28 = vld [vmem:[#allocation7 + $0x1c0] sm:$0xff] }
  0x3b   :  { %2043 = vmatpush1.bf16.msra.mxu1 %v2797_v57  ;;  %v118_v24 = vld [vmem:[#allocation7 + $0x1e8] sm:$0xff]  ;;  %v2827_v29 = vpack.c.bf16 %v112_v21, %v108_v20  ;;  %v107_v31 = vld [vmem:[#allocation7 + $0x190] sm:$0xff]  ;;  %v117_v35 = vld [vmem:[#allocation7 + $0x1e0] sm:$0xff] }
  0x3c   :  { %2045 = vmatprep.subr.bf16.mxu1 %v2803_v60  ;;  %v111_v33 = vld [vmem:[#allocation7 + $0x1b0] sm:$0xff]  ;;  %v2830_v34 = vpack.c.bf16 %v118_v24, %v114_v23  ;;  %v116_v37 = vld [vmem:[#allocation7 + $0x1d8] sm:$0xff]  ;;  %v2836_v41 = vpack.c.bf16 %v117_v35, %v113_v28  ;;  %v51_v49 = vld [vmem:[#allocation4] sm:$0xff] }
  0x3d   :  { %2015 = vmatpush1.bf16.msra.mxu0 %v2800_v58  ;;  %v120_v38 = vld [vmem:[#allocation7 + $0x1f8] sm:$0xff]  ;;  %v2833_v40 = vpack.c.bf16 %v111_v33, %v107_v31  ;;  %v115_v43 = vld [vmem:[#allocation7 + $0x1d0] sm:$0xff]  ;;  %v53_v50 = vunpack.c.l.bf16 %v51_v49  ;;  %v54_v52 = vunpack.c.h.bf16 %v51_v49  ;;  %v52_v53 = vld [vmem:[#allocation4 + $0x8] sm:$0xff] }
  0x3e   :  { %2017 = vmatprep.subr.bf16.mxu0 %v2806_v63  ;;  %v2839_v42 = vpack.c.bf16 %v120_v38, %v116_v37  ;;  %v119_v45 = vld [vmem:[#allocation7 + $0x1f0] sm:$0xff]  ;;  %v56_v59 = vunpack.c.h.bf16 %v52_v53  ;;  %v55_v5 = vunpack.c.l.bf16 %v52_v53  ;;  %v289_v53 = vld [vmem:[#allocation4 + $0x18] sm:$0xff] }
  0x3f   :  { %2047 = vmatpush1.bf16.msra.mxu1 %v2809_v7  ;;  %v2843_v47 = vpack.c.bf16 %v119_v45, %v115_v43 }
  0x40   :  { %2049 = vmatprep.subr.bf16.mxu1 %v2815_v12 }
  0x41   :  { %2019 = vmatpush1.bf16.msra.mxu0 %v2812_v10 }
  0x42   :  { %2021 = vmatprep.subr.bf16.mxu0 %v2818_v15 }
  0x43   :  { %2051 = vmatpush1.bf16.msra.mxu1 %v2821_v25 }
  0x44   :  { %2053 = vmatprep.subr.bf16.mxu1 %v2827_v29 }
  0x45   :  { %2023 = vmatpush1.bf16.msra.mxu0 %v2824_v27 }
  0x46   :  { %2025 = vmatprep.subr.bf16.mxu0 %v2830_v34 }
  0x47   :  { %2055 = vmatpush1.bf16.msra.mxu1 %v2833_v40 }
  0x48   :  { %2057 = vmatprep.subr.bf16.mxu1 %v2839_v42 }
  0x49   :  { %2027 = vmatpush1.bf16.msra.mxu0 %v2836_v41 }
  0x4a   :  { %2061 = vmatprep.subr.bf16.mxu0 %v2752_v4 }
  0x4b   :  { %2059 = vmatpush1.bf16.msra.mxu1 %v2843_v47 }
  0x4c   :  { %186 = vmatmul.mubr.f32.vlgmr.msra.gmra.mrb[0].mxu0 %v2701_v0  ;;  %2093 = vmatprep.subr.bf16.mxu1 %v2762_v17 }
  0x4d   :  { %2063 = vmatpush1.bf16.msra.mxu0 %v2754_v8  ;;  %422 = vmatprep.mubr.f32.mxu0 %v2701_v0 }
  0x4e   :  { %2065 = vmatprep.subr.bf16.mxu0 %v2756_v9  ;;  %257 = vmatmul.mubr.f32.vlgmr.msra.gmra.mrb[0].mxu1 %v2701_v0 }
  0x4f   :  { %2095 = vmatpush1.bf16.msra.mxu1 %v2764_v18  ;;  %493 = vmatprep.mubr.f32.mxu1 %v2701_v0 }
  0x50   :  { %2097 = vmatprep.subr.bf16.mxu1 %v2770_v26 }
  0x51   :  { %2067 = vmatpush1.bf16.msra.mxu0 %v2760_v16 }
  0x52   :  { %2069 = vmatprep.subr.bf16.mxu0 %v2767_v22 }
  0x53   :  { %2099 = vmatpush1.bf16.msra.mxu1 %v2773_v30 }
  0x54   :  { %2101 = vmatprep.subr.bf16.mxu1 %v2782_v39 }
  0x55   :  { %2071 = vmatpush1.bf16.msra.mxu0 %v2776_v32 }
  0x56   :  { %2073 = vmatprep.subr.bf16.mxu0 %v2780_v36 }
  0x57   :  { %2103 = vmatpush1.bf16.msra.mxu1 %v2785_v44 }
  0x58   :  { %2105 = vmatprep.subr.bf16.mxu1 %v2791_v48 }
  0x59   :  { %2075 = vmatpush1.bf16.msra.mxu0 %v2788_v46 }
  0x5a   :  { %2077 = vmatprep.subr.bf16.mxu0 %v2794_v51 }
  0x5b   :  { %2107 = vmatpush1.bf16.msra.mxu1 %v2797_v57 }
  0x5c   :  { %2109 = vmatprep.subr.bf16.mxu1 %v2803_v60 }
  0x5d   :  { %2079 = vmatpush1.bf16.msra.mxu0 %v2800_v58 }
  0x5e   :  { %2081 = vmatprep.subr.bf16.mxu0 %v2806_v63 }
  0x5f   :  { %2111 = vmatpush1.bf16.msra.mxu1 %v2809_v7 }
  0x60   :  { %2113 = vmatprep.subr.bf16.mxu1 %v2815_v12 }
  0x61   :  { %2083 = vmatpush1.bf16.msra.mxu0 %v2812_v10 }
  0x62   :  { %2085 = vmatprep.subr.bf16.mxu0 %v2818_v15 }
  0x63   :  { %2115 = vmatpush1.bf16.msra.mxu1 %v2821_v25 }
  0x64   :  { %2117 = vmatprep.subr.bf16.mxu1 %v2827_v29 }
  0x65   :  { %2087 = vmatpush1.bf16.msra.mxu0 %v2824_v27 }
  0x66   :  { %2089 = vmatprep.subr.bf16.mxu0 %v2830_v34 }
  0x67   :  { %2119 = vmatpush1.bf16.msra.mxu1 %v2833_v40 }
  0x68   :  { %2121 = vmatprep.subr.bf16.mxu1 %v2839_v42 }
  0x69   :  { %2091 = vmatpush1.bf16.msra.mxu0 %v2836_v41 }
  0x6a   :  { %2125 = vmatprep.subr.bf16.mxu0 %v2752_v4 }
  0x6b   :  { %2123 = vmatpush1.bf16.msra.mxu1 %v2843_v47 }
  0x6c   :  { %2157 = vmatprep.subr.bf16.mxu1 %v2762_v17 }
 0x11f   :  { %v187_v54 = vpop.f32.mrb[0].mxu0 }
 0x120   :  { %v263_v55 = vadd.f32 %v187_v54, %v53_v50  ;;  %v189_v56 = vpop.f32.mrb[1].mxu0  ;;  %v288_v50 = vld [vmem:[#allocation4 + $0x10] sm:$0xff] }
 0x121   :  { %v264_v61 = vadd.f32 %v189_v56, %v54_v52  ;;  %v258_v1 = vpop.f32.mrb[0].mxu1  ;;  %v290_v52 = vunpack.c.l.bf16 %v288_v50  ;;  %v291_v54 = vunpack.c.h.bf16 %v288_v50 }
 0x122   :  { %v267_v62 = vmul.f32 0.5, %v263_v55  ;;  %v260_v3 = vpop.f32.mrb[1].mxu1  ;;  %v265_v11 = vadd.f32 %v258_v1, %v55_v5 }
 0x123   :  { %v268_v2 = vmul.f32 0.5, %v264_v61  ;;  %v266_v6 = vadd.f32 %v260_v3, %v56_v59 }
 0x124   :  { %2519 = vtanh.f32 %v267_v62  ;;  %v269_v13 = vmul.f32 0.5, %v265_v11  ;;  %v293_v62 = vunpack.c.h.bf16 %v289_v53  ;;  %v292_v11 = vunpack.c.l.bf16 %v289_v53  ;;  %v1016_v53 = vld [vmem:[#allocation7 + $0x28] sm:$0xff] }
 0x125   :  { %2521 = vtanh.f32 %v268_v2 }
 0x126   :  { %2523 = vtanh.f32 %v266_v6 }
 0x127   :  { %2525 = vtanh.f32 %v269_v13 }
 0x12e   :  { %v2520_v14 = vpop.eup %2519 }
 0x12f   :  { %v2522_v19 = vpop.eup %2521  ;;  %v273_v20 = vmul.f32 0.5, %v2520_v14 }
 0x130   :  { %v2524_v21 = vpop.eup %2523  ;;  %v274_v23 = vmul.f32 0.5, %v2522_v19 }
 0x131   :  { %v276_v24 = vadd.f32 0.5, %v273_v20  ;;  %v2526_v37 = vpop.eup %2525 }
 0x132   :  { %v277_v28 = vadd.f32 0.5, %v274_v23  ;;  %v275_v38 = vmul.f32 0.5, %v2526_v37 }
 0x133   :  { %v281_v31 = vmul.f32 %v2524_v21, %v276_v24 }
 0x134   :  { %v280_v33 = vmul.f32 0.0, %v277_v28  ;;  %v278_v43 = vadd.f32 0.5, %v275_v38 }
 0x136   :  { %v2886_v35 = vadd.f32 %v281_v31, %v280_v33 }
 0x138   :  { %286 = vst [vmem:[#allocation10] sm:$0xff] %v2886_v35  ;;  %2527 = vtanh.f32 %v2886_v35 }
 0x142   :  { %v2528_v45 = vpop.eup %2527 }
 0x143   :  { %v284_v49 = vmul.f32 %v2528_v45, %v278_v43 }
 0x145   :  { %285 = vst [vmem:[#allocation9] sm:$0xff] %v284_v49  ;;  %423 = vmatmul.mubr.f32.vlgmr.msra.gmra.mrb[2].mxu0 %v284_v49  ;;  %494 = vmatmul.mubr.f32.vlgmr.msra.gmra.mrb[2].mxu1 %v284_v49 }
 0x146   :  { %2127 = vmatpush1.bf16.msra.mxu0 %v2754_v8  ;;  %2159 = vmatpush1.bf16.msra.mxu1 %v2764_v18 }
 0x147   :  { %2129 = vmatprep.subr.bf16.mxu0 %v2756_v9  ;;  %2161 = vmatprep.subr.bf16.mxu1 %v2770_v26 }
 0x148   :  { %661 = vmatprep.mubr.f32.mxu0 %v2701_v0  ;;  %732 = vmatprep.mubr.f32.mxu1 %v2701_v0 }
 0x14a   :  { %2131 = vmatpush1.bf16.msra.mxu0 %v2760_v16  ;;  %2163 = vmatpush1.bf16.msra.mxu1 %v2773_v30 }
 0x14b   :  { %2133 = vmatprep.subr.bf16.mxu0 %v2767_v22  ;;  %2165 = vmatprep.subr.bf16.mxu1 %v2782_v39 }
 0x14e   :  { %2135 = vmatpush1.bf16.msra.mxu0 %v2776_v32  ;;  %2167 = vmatpush1.bf16.msra.mxu1 %v2785_v44 }
 0x14f   :  { %2137 = vmatprep.subr.bf16.mxu0 %v2780_v36  ;;  %2169 = vmatprep.subr.bf16.mxu1 %v2791_v48 }
 0x152   :  { %2139 = vmatpush1.bf16.msra.mxu0 %v2788_v46  ;;  %2171 = vmatpush1.bf16.msra.mxu1 %v2797_v57 }
 0x153   :  { %2141 = vmatprep.subr.bf16.mxu0 %v2794_v51  ;;  %2173 = vmatprep.subr.bf16.mxu1 %v2803_v60 }
 0x156   :  { %2143 = vmatpush1.bf16.msra.mxu0 %v2800_v58  ;;  %2175 = vmatpush1.bf16.msra.mxu1 %v2809_v7 }
 0x157   :  { %2145 = vmatprep.subr.bf16.mxu0 %v2806_v63  ;;  %2177 = vmatprep.subr.bf16.mxu1 %v2815_v12 }
 0x15a   :  { %2147 = vmatpush1.bf16.msra.mxu0 %v2812_v10  ;;  %2179 = vmatpush1.bf16.msra.mxu1 %v2821_v25 }
 0x15b   :  { %2149 = vmatprep.subr.bf16.mxu0 %v2818_v15  ;;  %2181 = vmatprep.subr.bf16.mxu1 %v2827_v29 }
 0x15e   :  { %2151 = vmatpush1.bf16.msra.mxu0 %v2824_v27  ;;  %2183 = vmatpush1.bf16.msra.mxu1 %v2833_v40 }
 0x15f   :  { %2153 = vmatprep.subr.bf16.mxu0 %v2830_v34  ;;  %2185 = vmatprep.subr.bf16.mxu1 %v2839_v42 }
 0x162   :  { %2155 = vmatpush1.bf16.msra.mxu0 %v2836_v41  ;;  %2187 = vmatpush1.bf16.msra.mxu1 %v2843_v47 }
 0x163   :  { %2189 = vmatprep.subr.bf16.mxu0 %v2752_v4  ;;  %2221 = vmatprep.subr.bf16.mxu1 %v2762_v17 }
 0x218   :  { %v424_v55 = vpop.f32.mrb[2].mxu0  ;;  %v495_v56 = vpop.f32.mrb[2].mxu1 }
 0x219   :  { %v500_v59 = vadd.f32 %v424_v55, %v290_v52  ;;  %v426_v61 = vpop.f32.mrb[3].mxu0  ;;  %v497_v1 = vpop.f32.mrb[3].mxu1  ;;  %v502_v4 = vadd.f32 %v495_v56, %v292_v11  ;;  %v1012_v52 = vld [vmem:[#allocation7 + $0x8] sm:$0xff]  ;;  %v1018_v56 = vld [vmem:[#allocation7 + $0x38] sm:$0xff] }
 0x21a   :  { %v501_v2 = vadd.f32 %v426_v61, %v291_v54  ;;  %v503_v6 = vadd.f32 %v497_v1, %v293_v62  ;;  %v1014_v54 = vld [vmem:[#allocation7 + $0x18] sm:$0xff]  ;;  %v2968_v55 = vpack.c.bf16 %v1016_v53, %v1012_v52  ;;  %v1015_v61 = vld [vmem:[#allocation7 + $0x20] sm:$0xff]  ;;  %v1024_v11 = vld [vmem:[#allocation7 + $0x68] sm:$0xff] }
 0x21b   :  { %v504_v3 = vmul.f32 0.5, %v500_v59  ;;  %v506_v17 = vmul.f32 0.5, %v502_v4  ;;  %v1011_v59 = vld [vmem:[#allocation7] sm:$0xff]  ;;  %v2970_v62 = vpack.c.bf16 %v1018_v56, %v1014_v54  ;;  %v1022_v4 = vld [vmem:[#allocation7 + $0x58] sm:$0xff] }
 0x21c   :  { %v505_v5 = vmul.f32 0.5, %v501_v2  ;;  %v2972_v1 = vpack.c.bf16 %v1015_v61, %v1011_v59  ;;  %v1013_v2 = vld [vmem:[#allocation7 + $0x10] sm:$0xff]  ;;  %v1054_v52 = vld [vmem:[#allocation7 + $0x158] sm:$0xff]  ;;  %v1051_v56 = vld [vmem:[#allocation7 + $0x140] sm:$0xff] }
 0x21d   :  { %2529 = vtanh.f32 %v504_v3  ;;  %v1017_v3 = vld [vmem:[#allocation7 + $0x30] sm:$0xff]  ;;  %v1058_v54 = vld [vmem:[#allocation7 + $0x178] sm:$0xff]  ;;  %v1055_v59 = vld [vmem:[#allocation7 + $0x160] sm:$0xff] }
 0x21e   :  { %2531 = vtanh.f32 %v505_v5  ;;  %v2975_v5 = vpack.c.bf16 %v1017_v3, %v1013_v2  ;;  %v3030_v61 = vpack.c.bf16 %v1058_v54, %v1054_v52  ;;  %v3032_v2 = vpack.c.bf16 %v1055_v59, %v1051_v56  ;;  %v1053_v3 = vld [vmem:[#allocation7 + $0x150] sm:$0xff] }
 0x21f   :  { %2533 = vtanh.f32 %v503_v6  ;;  %v1020_v6 = vld [vmem:[#allocation7 + $0x48] sm:$0xff] }
 0x220   :  { %2535 = vtanh.f32 %v506_v17  ;;  %v2980_v17 = vpack.c.bf16 %v1024_v11, %v1020_v6  ;;  %v1057_v6 = vld [vmem:[#allocation7 + $0x170] sm:$0xff]  ;;  %v1060_v11 = vld [vmem:[#allocation7 + $0x188] sm:$0xff] }
 0x227   :  { %v2530_v13 = vpop.eup %2529 }
 0x228   :  { %v510_v14 = vmul.f32 0.5, %v2530_v13  ;;  %v2532_v19 = vpop.eup %2531  ;;  %v1026_v13 = vld [vmem:[#allocation7 + $0x78] sm:$0xff] }
 0x229   :  { %v511_v21 = vmul.f32 0.5, %v2532_v19  ;;  %v2534_v23 = vpop.eup %2533  ;;  %v1023_v19 = vld [vmem:[#allocation7 + $0x60] sm:$0xff] }
 0x22a   :  { %v513_v20 = vadd.f32 0.5, %v510_v14  ;;  %v2536_v37 = vpop.eup %2535  ;;  %v1019_v14 = vld [vmem:[#allocation7 + $0x40] sm:$0xff] }
 0x22b   :  { %v514_v24 = vadd.f32 0.5, %v511_v21  ;;  %v512_v38 = vmul.f32 0.5, %v2536_v37  ;;  %v2984_v21 = vpack.c.bf16 %v1023_v19, %v1019_v14  ;;  %v1030_v37 = vld [vmem:[#allocation7 + $0x98] sm:$0xff] }
 0x22c   :  { %v518_v28 = vmul.f32 %v2534_v23, %v513_v20  ;;  %v2982_v20 = vpack.c.bf16 %v1026_v13, %v1022_v4  ;;  %v1021_v23 = vld [vmem:[#allocation7 + $0x50] sm:$0xff]  ;;  %v3035_v4 = vpack.c.bf16 %v1057_v6, %v1053_v3  ;;  %v1064_v13 = vld [vmem:[#allocation7 + $0x1a8] sm:$0xff]  ;;  %v1062_v14 = vld [vmem:[#allocation7 + $0x198] sm:$0xff] }
 0x22d   :  { %v517_v31 = vmul.f32 %v514_v24, %v2886_v35  ;;  %v515_v43 = vadd.f32 0.5, %v512_v38  ;;  %v1025_v24 = vld [vmem:[#allocation7 + $0x70] sm:$0xff]  ;;  %v1066_v19 = vld [vmem:[#allocation7 + $0x1b8] sm:$0xff] }
 0x22f   :  { %v2925_v33 = vadd.f32 %v518_v28, %v517_v31  ;;  %v2987_v28 = vpack.c.bf16 %v1025_v24, %v1021_v23  ;;  %v1028_v31 = vld [vmem:[#allocation7 + $0x88] sm:$0xff]  ;;  %v3039_v23 = vpack.c.bf16 %v1064_v13, %v1060_v11  ;;  %v3041_v24 = vpack.c.bf16 %v1066_v19, %v1062_v14 }
 0x231   :  { %525 = vst [vmem:[#allocation10 + $0x8] sm:$0xff] %v2925_v33  ;;  %2537 = vtanh.f32 %v2925_v33 }
 0x23b   :  { %v2538_v45 = vpop.eup %2537 }
 0x23c   :  { %v521_v49 = vmul.f32 %v2538_v45, %v515_v43  ;;  %v1034_v43 = vld [vmem:[#allocation7 + $0xb8] sm:$0xff]  ;;  %v1027_v45 = vld [vmem:[#allocation7 + $0x80] sm:$0xff] }
 0x23e   :  { %523 = vst [vmem:[#allocation9 + $0x8] sm:$0xff] %v521_v49  ;;  %662 = vmatmul.mubr.f32.vlgmr.msra.gmra.mrb[4].mxu0 %v521_v49  ;;  %733 = vmatmul.mubr.f32.vlgmr.msra.gmra.mrb[4].mxu1 %v521_v49  ;;  %v1031_v49 = vld [vmem:[#allocation7 + $0xa0] sm:$0xff] }
 0x23f   :  { %2191 = vmatpush1.bf16.msra.mxu0 %v2754_v8  ;;  %2223 = vmatpush1.bf16.msra.mxu1 %v2764_v18  ;;  %v527_v8 = vld [vmem:[#allocation4 + $0x20] sm:$0xff] }
 0x240   :  { %2193 = vmatprep.subr.bf16.mxu0 %v2756_v9  ;;  %2225 = vmatprep.subr.bf16.mxu1 %v2770_v26  ;;  %v529_v9 = vunpack.c.l.bf16 %v527_v8  ;;  %v530_v18 = vunpack.c.h.bf16 %v527_v8  ;;  %v2994_v8 = vpack.c.bf16 %v1034_v43, %v1030_v37  ;;  %v1061_v37 = vld [vmem:[#allocation7 + $0x190] sm:$0xff] }
 0x241   :  { %900 = vmatprep.mubr.f32.mxu0 %v2701_v0  ;;  %971 = vmatprep.mubr.f32.mxu1 %v2701_v0 }
 0x243   :  { %2195 = vmatpush1.bf16.msra.mxu0 %v2760_v16  ;;  %2227 = vmatpush1.bf16.msra.mxu1 %v2773_v30  ;;  %v528_v16 = vld [vmem:[#allocation4 + $0x28] sm:$0xff] }
 0x244   :  { %2197 = vmatprep.subr.bf16.mxu0 %v2767_v22  ;;  %2229 = vmatprep.subr.bf16.mxu1 %v2782_v39 }
 0x247   :  { %2199 = vmatpush1.bf16.msra.mxu0 %v2776_v32  ;;  %2231 = vmatpush1.bf16.msra.mxu1 %v2785_v44 }
 0x248   :  { %2201 = vmatprep.subr.bf16.mxu0 %v2780_v36  ;;  %2233 = vmatprep.subr.bf16.mxu1 %v2791_v48  ;;  %v532_v36 = vunpack.c.h.bf16 %v528_v16 }
 0x24b   :  { %2203 = vmatpush1.bf16.msra.mxu0 %v2788_v46  ;;  %2235 = vmatpush1.bf16.msra.mxu1 %v2797_v57  ;;  %v531_v57 = vunpack.c.l.bf16 %v528_v16  ;;  %v1029_v16 = vld [vmem:[#allocation7 + $0x90] sm:$0xff] }
 0x24c   :  { %2205 = vmatprep.subr.bf16.mxu0 %v2794_v51  ;;  %2237 = vmatprep.subr.bf16.mxu1 %v2803_v60 }
 0x24f   :  { %2207 = vmatpush1.bf16.msra.mxu0 %v2800_v58  ;;  %2239 = vmatpush1.bf16.msra.mxu1 %v2809_v7 }
 0x250   :  { %2209 = vmatprep.subr.bf16.mxu0 %v2806_v63  ;;  %2241 = vmatprep.subr.bf16.mxu1 %v2815_v12 }
 0x253   :  { %2211 = vmatpush1.bf16.msra.mxu0 %v2812_v10  ;;  %2243 = vmatpush1.bf16.msra.mxu1 %v2821_v25 }
 0x254   :  { %2213 = vmatprep.subr.bf16.mxu0 %v2818_v15  ;;  %2245 = vmatprep.subr.bf16.mxu1 %v2827_v29 }
 0x257   :  { %2215 = vmatpush1.bf16.msra.mxu0 %v2824_v27  ;;  %2247 = vmatpush1.bf16.msra.mxu1 %v2833_v40 }
 0x258   :  { %2217 = vmatprep.subr.bf16.mxu0 %v2830_v34  ;;  %2249 = vmatprep.subr.bf16.mxu1 %v2839_v42 }
 0x25b   :  { %2219 = vmatpush1.bf16.msra.mxu0 %v2836_v41  ;;  %2251 = vmatpush1.bf16.msra.mxu1 %v2843_v47 }
 0x25c   :  { %2253 = vmatprep.subr.bf16.mxu0 %v2968_v55  ;;  %2285 = vmatprep.subr.bf16.mxu1 %v2970_v62 }
 0x311   :  { %v663_v22 = vpop.f32.mrb[4].mxu0  ;;  %v734_v26 = vpop.f32.mrb[4].mxu1 }
 0x312   :  { %v739_v30 = vadd.f32 %v663_v22, %v529_v9  ;;  %v665_v32 = vpop.f32.mrb[5].mxu0  ;;  %v736_v39 = vpop.f32.mrb[5].mxu1  ;;  %v741_v58 = vadd.f32 %v734_v26, %v531_v57  ;;  %v2996_v9 = vpack.c.bf16 %v1031_v49, %v1027_v45  ;;  %v1036_v26 = vld [vmem:[#allocation7 + $0xc8] sm:$0xff]  ;;  %v1037_v57 = vld [vmem:[#allocation7 + $0xd0] sm:$0xff] }
 0x313   :  { %v740_v44 = vadd.f32 %v665_v32, %v530_v18  ;;  %v742_v51 = vadd.f32 %v736_v39, %v532_v36  ;;  %v1033_v18 = vld [vmem:[#allocation7 + $0xb0] sm:$0xff]  ;;  %v1038_v32 = vld [vmem:[#allocation7 + $0xd8] sm:$0xff]  ;;  %v1068_v49 = vld [vmem:[#allocation7 + $0x1c8] sm:$0xff] }
 0x314   :  { %v743_v46 = vmul.f32 0.5, %v739_v30  ;;  %v745_v60 = vmul.f32 0.5, %v741_v58  ;;  %v2999_v22 = vpack.c.bf16 %v1033_v18, %v1029_v16  ;;  %v1040_v30 = vld [vmem:[#allocation7 + $0xe8] sm:$0xff]  ;;  %v1042_v39 = vld [vmem:[#allocation7 + $0xf8] sm:$0xff]  ;;  %v1041_v58 = vld [vmem:[#allocation7 + $0xf0] sm:$0xff] }
 0x315   :  { %v744_v48 = vmul.f32 0.5, %v740_v44  ;;  %v3004_v36 = vpack.c.bf16 %v1040_v30, %v1036_v26  ;;  %v1035_v44 = vld [vmem:[#allocation7 + $0xc0] sm:$0xff]  ;;  %v1065_v45 = vld [vmem:[#allocation7 + $0x1b0] sm:$0xff]  ;;  %v1072_v16 = vld [vmem:[#allocation7 + $0x1e8] sm:$0xff] }
 0x316   :  { %2539 = vtanh.f32 %v743_v46  ;;  %v1039_v46 = vld [vmem:[#allocation7 + $0xe0] sm:$0xff]  ;;  %v3048_v18 = vpack.c.bf16 %v1065_v45, %v1061_v37  ;;  %v3050_v26 = vpack.c.bf16 %v1072_v16, %v1068_v49  ;;  %v1070_v30 = vld [vmem:[#allocation7 + $0x1d8] sm:$0xff] }
 0x317   :  { %2541 = vtanh.f32 %v744_v48  ;;  %v3006_v48 = vpack.c.bf16 %v1042_v39, %v1038_v32  ;;  %v1074_v32 = vld [vmem:[#allocation7 + $0x1f8] sm:$0xff]  ;;  %v1067_v39 = vld [vmem:[#allocation7 + $0x1c0] sm:$0xff] }
 0x318   :  { %2543 = vtanh.f32 %v742_v51  ;;  %v3008_v51 = vpack.c.bf16 %v1039_v46, %v1035_v44  ;;  %v3052_v44 = vpack.c.bf16 %v1074_v32, %v1070_v30  ;;  %v1071_v46 = vld [vmem:[#allocation7 + $0x1e0] sm:$0xff] }
 0x319   :  { %2545 = vtanh.f32 %v745_v60  ;;  %v3011_v60 = vpack.c.bf16 %v1041_v58, %v1037_v57  ;;  %v1069_v57 = vld [vmem:[#allocation7 + $0x1d0] sm:$0xff] }
 0x31a   :  { %v1073_v58 = vld [vmem:[#allocation7 + $0x1f0] sm:$0xff] }
 0x320   :  { %v2540_v63 = vpop.eup %2539 }
 0x321   :  { %v749_v7 = vmul.f32 0.5, %v2540_v63  ;;  %v2542_v10 = vpop.eup %2541  ;;  %v1044_v63 = vld [vmem:[#allocation7 + $0x108] sm:$0xff] }
 0x322   :  { %v750_v15 = vmul.f32 0.5, %v2542_v10  ;;  %v2544_v25 = vpop.eup %2543  ;;  %v1046_v10 = vld [vmem:[#allocation7 + $0x118] sm:$0xff] }
 0x323   :  { %v752_v12 = vadd.f32 0.5, %v749_v7  ;;  %v2546_v41 = vpop.eup %2545  ;;  %v1048_v7 = vld [vmem:[#allocation7 + $0x128] sm:$0xff] }
 0x324   :  { %v753_v27 = vadd.f32 0.5, %v750_v15  ;;  %v751_v42 = vmul.f32 0.5, %v2546_v41  ;;  %v1050_v15 = vld [vmem:[#allocation7 + $0x138] sm:$0xff]  ;;  %v1045_v41 = vld [vmem:[#allocation7 + $0x110] sm:$0xff] }
 0x325   :  { %v757_v29 = vmul.f32 %v2544_v25, %v752_v12  ;;  %v3016_v12 = vpack.c.bf16 %v1048_v7, %v1044_v63  ;;  %v1043_v25 = vld [vmem:[#allocation7 + $0x100] sm:$0xff]  ;;  %v3055_v63 = vpack.c.bf16 %v1071_v46, %v1067_v39  ;;  %v3059_v7 = vpack.c.bf16 %v1073_v58, %v1069_v57 }
 0x326   :  { %v756_v34 = vmul.f32 %v753_v27, %v2925_v33  ;;  %v754_v47 = vadd.f32 0.5, %v751_v42  ;;  %v1032_v33 = vld [vmem:[#allocation7 + $0xa8] sm:$0xff]  ;;  %v1047_v27 = vld [vmem:[#allocation7 + $0x120] sm:$0xff]  ;;  %v1049_v42 = vld [vmem:[#allocation7 + $0x130] sm:$0xff] }
 0x327   :  { %v2992_v38 = vpack.c.bf16 %v1032_v33, %v1028_v31  ;;  %v1059_v31 = vld [vmem:[#allocation7 + $0x180] sm:$0xff] }
 0x328   :  { %v2962_v40 = vadd.f32 %v757_v29, %v756_v34  ;;  %v3018_v29 = vpack.c.bf16 %v1050_v15, %v1046_v10  ;;  %v3020_v34 = vpack.c.bf16 %v1047_v27, %v1043_v25  ;;  %v1063_v33 = vld [vmem:[#allocation7 + $0x1a0] sm:$0xff]  ;;  %v766_v10 = vld [vmem:[#allocation4 + $0x30] sm:$0xff]  ;;  %v767_v25 = vld [vmem:[#allocation4 + $0x38] sm:$0xff] }
 0x329   :  { %v3044_v43 = vpack.c.bf16 %v1063_v33, %v1059_v31  ;;  %v768_v15 = vunpack.c.l.bf16 %v766_v10  ;;  %v769_v27 = vunpack.c.h.bf16 %v766_v10  ;;  %v771_v52 = vunpack.c.h.bf16 %v767_v25 }
 0x32a   :  { %764 = vst [vmem:[#allocation10 + $0x10] sm:$0xff] %v2962_v40  ;;  %2547 = vtanh.f32 %v2962_v40  ;;  %v770_v11 = vunpack.c.l.bf16 %v767_v25 }
 0x334   :  { %v2548_v35 = vpop.eup %2547 }
 0x335   :  { %v760_v50 = vmul.f32 %v2548_v35, %v754_v47  ;;  %v3023_v47 = vpack.c.bf16 %v1049_v42, %v1045_v41  ;;  %v1052_v35 = vld [vmem:[#allocation7 + $0x148] sm:$0xff] }
 0x337   :  { %762 = vst [vmem:[#allocation9 + $0x10] sm:$0xff] %v760_v50  ;;  %901 = vmatmul.mubr.f32.vlgmr.msra.gmra.mrb[6].mxu0 %v760_v50  ;;  %972 = vmatmul.mubr.f32.vlgmr.msra.gmra.mrb[6].mxu1 %v760_v50  ;;  %v1056_v50 = vld [vmem:[#allocation7 + $0x168] sm:$0xff] }
 0x338   :  { %1139 = vmatprep.mubr.f32.mxu0 %v2701_v0  ;;  %1210 = vmatprep.mubr.f32.mxu1 %v2701_v0  ;;  %v3028_v53 = vpack.c.bf16 %v1056_v50, %v1052_v35 }
 0x339   :  { %2255 = vmatpush1.bf16.msra.mxu0 %v2972_v1  ;;  %2287 = vmatpush1.bf16.msra.mxu1 %v2975_v5 }
 0x33a   :  { %2257 = vmatprep.subr.bf16.mxu0 %v2980_v17  ;;  %2289 = vmatprep.subr.bf16.mxu1 %v2982_v20 }
 0x33d   :  { %2259 = vmatpush1.bf16.msra.mxu0 %v2984_v21  ;;  %2291 = vmatpush1.bf16.msra.mxu1 %v2987_v28 }
 0x33e   :  { %2261 = vmatprep.subr.bf16.mxu0 %v2992_v38  ;;  %2293 = vmatprep.subr.bf16.mxu1 %v2994_v8 }
 0x341   :  { %2263 = vmatpush1.bf16.msra.mxu0 %v2996_v9  ;;  %2295 = vmatpush1.bf16.msra.mxu1 %v2999_v22 }
 0x342   :  { %2265 = vmatprep.subr.bf16.mxu0 %v3004_v36  ;;  %2297 = vmatprep.subr.bf16.mxu1 %v3006_v48 }
 0x345   :  { %2267 = vmatpush1.bf16.msra.mxu0 %v3008_v51  ;;  %2299 = vmatpush1.bf16.msra.mxu1 %v3011_v60 }
 0x346   :  { %2269 = vmatprep.subr.bf16.mxu0 %v3016_v12  ;;  %2301 = vmatprep.subr.bf16.mxu1 %v3018_v29 }
 0x349   :  { %2271 = vmatpush1.bf16.msra.mxu0 %v3020_v34  ;;  %2303 = vmatpush1.bf16.msra.mxu1 %v3023_v47 }
 0x34a   :  { %2273 = vmatprep.subr.bf16.mxu0 %v3028_v53  ;;  %2305 = vmatprep.subr.bf16.mxu1 %v3030_v61 }
 0x34d   :  { %2275 = vmatpush1.bf16.msra.mxu0 %v3032_v2  ;;  %2307 = vmatpush1.bf16.msra.mxu1 %v3035_v4 }
 0x34e   :  { %2277 = vmatprep.subr.bf16.mxu0 %v3039_v23  ;;  %2309 = vmatprep.subr.bf16.mxu1 %v3041_v24 }
 0x351   :  { %2279 = vmatpush1.bf16.msra.mxu0 %v3044_v43  ;;  %2311 = vmatpush1.bf16.msra.mxu1 %v3048_v18 }
 0x352   :  { %2281 = vmatprep.subr.bf16.mxu0 %v3050_v26  ;;  %2313 = vmatprep.subr.bf16.mxu1 %v3052_v44 }
 0x355   :  { %2283 = vmatpush1.bf16.msra.mxu0 %v3055_v63  ;;  %2315 = vmatpush1.bf16.msra.mxu1 %v3059_v7 }
 0x356   :  { %2317 = vmatprep.subr.bf16.mxu0 %v2968_v55  ;;  %2349 = vmatprep.subr.bf16.mxu1 %v2970_v62 }
 0x40a   :  { %v902_v41 = vpop.f32.mrb[6].mxu0  ;;  %v973_v42 = vpop.f32.mrb[6].mxu1 }
 0x40b   :  { %v978_v35 = vadd.f32 %v902_v41, %v768_v15  ;;  %v904_v50 = vpop.f32.mrb[7].mxu0  ;;  %v975_v54 = vpop.f32.mrb[7].mxu1  ;;  %v980_v13 = vadd.f32 %v973_v42, %v770_v11 }
 0x40c   :  { %v979_v56 = vadd.f32 %v904_v50, %v769_v27  ;;  %v981_v6 = vadd.f32 %v975_v54, %v771_v52  ;;  %v1006_v27 = vld [vmem:[#allocation4 + $0x48] sm:$0xff] }
 0x40d   :  { %v982_v59 = vmul.f32 0.5, %v978_v35  ;;  %v984_v14 = vmul.f32 0.5, %v980_v13  ;;  %v1010_v54 = vunpack.c.h.bf16 %v1006_v27  ;;  %v1009_v13 = vunpack.c.l.bf16 %v1006_v27 }
 0x40e   :  { %v983_v3 = vmul.f32 0.5, %v979_v56 }
 0x40f   :  { %2549 = vtanh.f32 %v982_v59 }
 0x410   :  { %2551 = vtanh.f32 %v983_v3 }
 0x411   :  { %2553 = vtanh.f32 %v981_v6 }
 0x412   :  { %2555 = vtanh.f32 %v984_v14 }
 0x419   :  { %v2550_v19 = vpop.eup %2549 }
 0x41a   :  { %v988_v31 = vmul.f32 0.5, %v2550_v19  ;;  %v2552_v33 = vpop.eup %2551 }
 0x41b   :  { %v989_v45 = vmul.f32 0.5, %v2552_v33  ;;  %v2554_v49 = vpop.eup %2553 }
 0x41c   :  { %v991_v37 = vadd.f32 0.5, %v988_v31  ;;  %v2556_v46 = vpop.eup %2555 }
 0x41d   :  { %v992_v16 = vadd.f32 0.5, %v989_v45  ;;  %v990_v57 = vmul.f32 0.5, %v2556_v46 }
 0x41e   :  { %v996_v30 = vmul.f32 %v2554_v49, %v991_v37 }
 0x41f   :  { %v995_v32 = vmul.f32 %v992_v16, %v2962_v40  ;;  %v993_v58 = vadd.f32 0.5, %v990_v57  ;;  %v1005_v40 = vld [vmem:[#allocation4 + $0x40] sm:$0xff] }
 0x420   :  { %v1007_v25 = vunpack.c.l.bf16 %v1005_v40  ;;  %v1008_v41 = vunpack.c.h.bf16 %v1005_v40 }
 0x421   :  { %v3067_v39 = vadd.f32 %v996_v30, %v995_v32 }
 0x423   :  { %1003 = vst [vmem:[#allocation10 + $0x18] sm:$0xff] %v3067_v39  ;;  %2557 = vtanh.f32 %v3067_v39 }
 0x42d   :  { %v2558_v10 = vpop.eup %2557 }
 0x42e   :  { %v999_v15 = vmul.f32 %v2558_v10, %v993_v58 }
 0x430   :  { %1001 = vst [vmem:[#allocation9 + $0x18] sm:$0xff] %v999_v15  ;;  %1140 = vmatmul.mubr.f32.vlgmr.msra.gmra.mrb[8].mxu0 %v999_v15  ;;  %1211 = vmatmul.mubr.f32.vlgmr.msra.gmra.mrb[8].mxu1 %v999_v15 }
 0x431   :  { %2319 = vmatpush1.bf16.msra.mxu0 %v2972_v1  ;;  %2351 = vmatpush1.bf16.msra.mxu1 %v2975_v5 }
 0x432   :  { %2321 = vmatprep.subr.bf16.mxu0 %v2980_v17  ;;  %2353 = vmatprep.subr.bf16.mxu1 %v2982_v20 }
 0x433   :  { %1378 = vmatprep.mubr.f32.mxu0 %v2701_v0  ;;  %1449 = vmatprep.mubr.f32.mxu1 %v2701_v0 }
 0x435   :  { %2323 = vmatpush1.bf16.msra.mxu0 %v2984_v21  ;;  %2355 = vmatpush1.bf16.msra.mxu1 %v2987_v28 }
 0x436   :  { %2325 = vmatprep.subr.bf16.mxu0 %v2992_v38  ;;  %2357 = vmatprep.subr.bf16.mxu1 %v2994_v8 }
 0x439   :  { %2327 = vmatpush1.bf16.msra.mxu0 %v2996_v9  ;;  %2359 = vmatpush1.bf16.msra.mxu1 %v2999_v22 }
 0x43a   :  { %2329 = vmatprep.subr.bf16.mxu0 %v3004_v36  ;;  %2361 = vmatprep.subr.bf16.mxu1 %v3006_v48 }
 0x43d   :  { %2331 = vmatpush1.bf16.msra.mxu0 %v3008_v51  ;;  %2363 = vmatpush1.bf16.msra.mxu1 %v3011_v60 }
 0x43e   :  { %2333 = vmatprep.subr.bf16.mxu0 %v3016_v12  ;;  %2365 = vmatprep.subr.bf16.mxu1 %v3018_v29 }
 0x441   :  { %2335 = vmatpush1.bf16.msra.mxu0 %v3020_v34  ;;  %2367 = vmatpush1.bf16.msra.mxu1 %v3023_v47 }
 0x442   :  { %2337 = vmatprep.subr.bf16.mxu0 %v3028_v53  ;;  %2369 = vmatprep.subr.bf16.mxu1 %v3030_v61 }
 0x445   :  { %2339 = vmatpush1.bf16.msra.mxu0 %v3032_v2  ;;  %2371 = vmatpush1.bf16.msra.mxu1 %v3035_v4 }
 0x446   :  { %2341 = vmatprep.subr.bf16.mxu0 %v3039_v23  ;;  %2373 = vmatprep.subr.bf16.mxu1 %v3041_v24 }
 0x449   :  { %2343 = vmatpush1.bf16.msra.mxu0 %v3044_v43  ;;  %2375 = vmatpush1.bf16.msra.mxu1 %v3048_v18 }
 0x44a   :  { %2345 = vmatprep.subr.bf16.mxu0 %v3050_v26  ;;  %2377 = vmatprep.subr.bf16.mxu1 %v3052_v44 }
 0x44d   :  { %2347 = vmatpush1.bf16.msra.mxu0 %v3055_v63  ;;  %2379 = vmatpush1.bf16.msra.mxu1 %v3059_v7 }
 0x44e   :  { %2381 = vmatprep.subr.bf16.mxu0 %v2968_v55  ;;  %2413 = vmatprep.subr.bf16.mxu1 %v2970_v62 }
 0x503   :  { %v1141_v42 = vpop.f32.mrb[8].mxu0  ;;  %v1212_v35 = vpop.f32.mrb[8].mxu1 }
 0x504   :  { %v1217_v50 = vadd.f32 %v1141_v42, %v1007_v25  ;;  %v1143_v52 = vpop.f32.mrb[9].mxu0  ;;  %v1214_v56 = vpop.f32.mrb[9].mxu1  ;;  %v1219_v14 = vadd.f32 %v1212_v35, %v1009_v13 }
 0x505   :  { %v1218_v59 = vadd.f32 %v1143_v52, %v1008_v41  ;;  %v1220_v11 = vadd.f32 %v1214_v56, %v1010_v54  ;;  %v1245_v41 = vld [vmem:[#allocation4 + $0x58] sm:$0xff] }
 0x506   :  { %v1221_v3 = vmul.f32 0.5, %v1217_v50  ;;  %v1223_v19 = vmul.f32 0.5, %v1219_v14  ;;  %v1249_v56 = vunpack.c.h.bf16 %v1245_v41  ;;  %v1248_v14 = vunpack.c.l.bf16 %v1245_v41  ;;  %v1723_v41 = vld [vmem:[#allocation4 + $0x78] sm:$0xff] }
 0x507   :  { %v1222_v6 = vmul.f32 0.5, %v1218_v59 }
 0x508   :  { %2559 = vtanh.f32 %v1221_v3 }
 0x509   :  { %2561 = vtanh.f32 %v1222_v6 }
 0x50a   :  { %2563 = vtanh.f32 %v1220_v11 }
 0x50b   :  { %2565 = vtanh.f32 %v1223_v19 }
 0x512   :  { %v2560_v31 = vpop.eup %2559 }
 0x513   :  { %v1227_v33 = vmul.f32 0.5, %v2560_v31  ;;  %v2562_v37 = vpop.eup %2561 }
 0x514   :  { %v1228_v49 = vmul.f32 0.5, %v2562_v37  ;;  %v2564_v16 = vpop.eup %2563 }
 0x515   :  { %v1230_v45 = vadd.f32 0.5, %v1227_v33  ;;  %v2566_v58 = vpop.eup %2565 }
 0x516   :  { %v1231_v30 = vadd.f32 0.5, %v1228_v49  ;;  %v1229_v10 = vmul.f32 0.5, %v2566_v58 }
 0x517   :  { %v1235_v32 = vmul.f32 %v2564_v16, %v1230_v45 }
 0x518   :  { %v1234_v46 = vmul.f32 %v1231_v30, %v3067_v39  ;;  %v1232_v15 = vadd.f32 0.5, %v1229_v10  ;;  %v1244_v39 = vld [vmem:[#allocation4 + $0x50] sm:$0xff] }
 0x519   :  { %v1246_v27 = vunpack.c.l.bf16 %v1244_v39  ;;  %v1247_v42 = vunpack.c.h.bf16 %v1244_v39  ;;  %v1722_v39 = vld [vmem:[#allocation4 + $0x70] sm:$0xff] }
 0x51a   :  { %v3106_v57 = vadd.f32 %v1235_v32, %v1234_v46 }
 0x51c   :  { %1242 = vst [vmem:[#allocation10 + $0x20] sm:$0xff] %v3106_v57  ;;  %2567 = vtanh.f32 %v3106_v57 }
 0x526   :  { %v2568_v40 = vpop.eup %2567 }
 0x527   :  { %v1238_v25 = vmul.f32 %v2568_v40, %v1232_v15 }
 0x529   :  { %1240 = vst [vmem:[#allocation9 + $0x20] sm:$0xff] %v1238_v25  ;;  %1379 = vmatmul.mubr.f32.vlgmr.msra.gmra.mrb[10].mxu0 %v1238_v25  ;;  %1450 = vmatmul.mubr.f32.vlgmr.msra.gmra.mrb[10].mxu1 %v1238_v25 }
 0x52a   :  { %2383 = vmatpush1.bf16.msra.mxu0 %v2972_v1  ;;  %2415 = vmatpush1.bf16.msra.mxu1 %v2975_v5 }
 0x52b   :  { %2385 = vmatprep.subr.bf16.mxu0 %v2980_v17  ;;  %2417 = vmatprep.subr.bf16.mxu1 %v2982_v20 }
 0x52c   :  { %1617 = vmatprep.mubr.f32.mxu0 %v2701_v0  ;;  %1688 = vmatprep.mubr.f32.mxu1 %v2701_v0 }
 0x52e   :  { %2387 = vmatpush1.bf16.msra.mxu0 %v2984_v21  ;;  %2419 = vmatpush1.bf16.msra.mxu1 %v2987_v28 }
 0x52f   :  { %2389 = vmatprep.subr.bf16.mxu0 %v2992_v38  ;;  %2421 = vmatprep.subr.bf16.mxu1 %v2994_v8 }
 0x532   :  { %2391 = vmatpush1.bf16.msra.mxu0 %v2996_v9  ;;  %2423 = vmatpush1.bf16.msra.mxu1 %v2999_v22 }
 0x533   :  { %2393 = vmatprep.subr.bf16.mxu0 %v3004_v36  ;;  %2425 = vmatprep.subr.bf16.mxu1 %v3006_v48 }
 0x536   :  { %2395 = vmatpush1.bf16.msra.mxu0 %v3008_v51  ;;  %2427 = vmatpush1.bf16.msra.mxu1 %v3011_v60 }
 0x537   :  { %2397 = vmatprep.subr.bf16.mxu0 %v3016_v12  ;;  %2429 = vmatprep.subr.bf16.mxu1 %v3018_v29 }
 0x53a   :  { %2399 = vmatpush1.bf16.msra.mxu0 %v3020_v34  ;;  %2431 = vmatpush1.bf16.msra.mxu1 %v3023_v47 }
 0x53b   :  { %2401 = vmatprep.subr.bf16.mxu0 %v3028_v53  ;;  %2433 = vmatprep.subr.bf16.mxu1 %v3030_v61 }
 0x53e   :  { %2403 = vmatpush1.bf16.msra.mxu0 %v3032_v2  ;;  %2435 = vmatpush1.bf16.msra.mxu1 %v3035_v4 }
 0x53f   :  { %2405 = vmatprep.subr.bf16.mxu0 %v3039_v23  ;;  %2437 = vmatprep.subr.bf16.mxu1 %v3041_v24 }
 0x542   :  { %2407 = vmatpush1.bf16.msra.mxu0 %v3044_v43  ;;  %2439 = vmatpush1.bf16.msra.mxu1 %v3048_v18 }
 0x543   :  { %2409 = vmatprep.subr.bf16.mxu0 %v3050_v26  ;;  %2441 = vmatprep.subr.bf16.mxu1 %v3052_v44 }
 0x546   :  { %2411 = vmatpush1.bf16.msra.mxu0 %v3055_v63  ;;  %2443 = vmatpush1.bf16.msra.mxu1 %v3059_v7 }
 0x547   :  { %2445 = vmatprep.subr.bf16.mxu0 %v2968_v55  ;;  %2477 = vmatprep.subr.bf16.mxu1 %v2970_v62 }
 0x5fc   :  { %v1380_v35 = vpop.f32.mrb[10].mxu0  ;;  %v1451_v50 = vpop.f32.mrb[10].mxu1 }
 0x5fd   :  { %v1456_v52 = vadd.f32 %v1380_v35, %v1246_v27  ;;  %v1382_v54 = vpop.f32.mrb[11].mxu0  ;;  %v1453_v59 = vpop.f32.mrb[11].mxu1  ;;  %v1458_v55 = vadd.f32 %v1451_v50, %v1248_v14  ;;  %v1724_v27 = vunpack.c.l.bf16 %v1722_v39  ;;  %v1726_v14 = vunpack.c.l.bf16 %v1723_v41 }
 0x5fe   :  { %v1457_v3 = vadd.f32 %v1382_v54, %v1247_v42  ;;  %v1459_v13 = vadd.f32 %v1453_v59, %v1249_v56  ;;  %v1725_v42 = vunpack.c.h.bf16 %v1722_v39  ;;  %v1727_v56 = vunpack.c.h.bf16 %v1723_v41 }
 0x5ff   :  { %v1460_v6 = vmul.f32 0.5, %v1456_v52  ;;  %v1462_v62 = vmul.f32 0.5, %v1458_v55 }
 0x600   :  { %v1461_v11 = vmul.f32 0.5, %v1457_v3 }
 0x601   :  { %2569 = vtanh.f32 %v1460_v6 }
 0x602   :  { %2571 = vtanh.f32 %v1461_v11 }
 0x603   :  { %2573 = vtanh.f32 %v1459_v13 }
 0x604   :  { %2575 = vtanh.f32 %v1462_v62 }
 0x60b   :  { %v2570_v19 = vpop.eup %2569 }
 0x60c   :  { %v1466_v31 = vmul.f32 0.5, %v2570_v19  ;;  %v2572_v33 = vpop.eup %2571 }
 0x60d   :  { %v1467_v45 = vmul.f32 0.5, %v2572_v33  ;;  %v2574_v49 = vpop.eup %2573 }
 0x60e   :  { %v1469_v37 = vadd.f32 0.5, %v1466_v31  ;;  %v2576_v58 = vpop.eup %2575 }
 0x60f   :  { %v1470_v16 = vadd.f32 0.5, %v1467_v45  ;;  %v1468_v10 = vmul.f32 0.5, %v2576_v58 }
 0x610   :  { %v1474_v30 = vmul.f32 %v2574_v49, %v1469_v37 }
 0x611   :  { %v1473_v32 = vmul.f32 %v1470_v16, %v3106_v57  ;;  %v1471_v15 = vadd.f32 0.5, %v1468_v10 }
 0x613   :  { %v3145_v46 = vadd.f32 %v1474_v30, %v1473_v32 }
 0x615   :  { %1481 = vst [vmem:[#allocation10 + $0x28] sm:$0xff] %v3145_v46  ;;  %2577 = vtanh.f32 %v3145_v46 }
 0x61f   :  { %v2578_v40 = vpop.eup %2577 }
 0x620   :  { %v1477_v25 = vmul.f32 %v2578_v40, %v1471_v15 }
 0x622   :  { %1479 = vst [vmem:[#allocation9 + $0x28] sm:$0xff] %v1477_v25  ;;  %1618 = vmatmul.mubr.f32.vlgmr.msra.gmra.mrb[12].mxu0 %v1477_v25  ;;  %1689 = vmatmul.mubr.f32.vlgmr.msra.gmra.mrb[12].mxu1 %v1477_v25 }
 0x623   :  { %2447 = vmatpush1.bf16.msra.mxu0 %v2972_v1  ;;  %2479 = vmatpush1.bf16.msra.mxu1 %v2975_v5  ;;  %v1484_v5 = vld [vmem:[#allocation4 + $0x68] sm:$0xff] }
 0x624   :  { %2449 = vmatprep.subr.bf16.mxu0 %v2980_v17  ;;  %2481 = vmatprep.subr.bf16.mxu1 %v2982_v20 }
 0x625   :  { %1856 = vmatprep.mubr.f32.mxu0 %v2701_v0  ;;  %1927 = vmatprep.mubr.f32.mxu1 %v2701_v0  ;;  %v1483_v0 = vld [vmem:[#allocation4 + $0x60] sm:$0xff] }
 0x626   :  { %v1485_v1 = vunpack.c.l.bf16 %v1483_v0  ;;  %v1486_v17 = vunpack.c.h.bf16 %v1483_v0 }
 0x627   :  { %2451 = vmatpush1.bf16.msra.mxu0 %v2984_v21  ;;  %2483 = vmatpush1.bf16.msra.mxu1 %v2987_v28 }
 0x628   :  { %2453 = vmatprep.subr.bf16.mxu0 %v2992_v38  ;;  %2485 = vmatprep.subr.bf16.mxu1 %v2994_v8  ;;  %v1488_v8 = vunpack.c.h.bf16 %v1484_v5 }
 0x62b   :  { %2455 = vmatpush1.bf16.msra.mxu0 %v2996_v9  ;;  %2487 = vmatpush1.bf16.msra.mxu1 %v2999_v22 }
 0x62c   :  { %2457 = vmatprep.subr.bf16.mxu0 %v3004_v36  ;;  %2489 = vmatprep.subr.bf16.mxu1 %v3006_v48 }
 0x62f   :  { %2459 = vmatpush1.bf16.msra.mxu0 %v3008_v51  ;;  %2491 = vmatpush1.bf16.msra.mxu1 %v3011_v60  ;;  %v1487_v60 = vunpack.c.l.bf16 %v1484_v5 }
 0x630   :  { %2461 = vmatprep.subr.bf16.mxu0 %v3016_v12  ;;  %2493 = vmatprep.subr.bf16.mxu1 %v3018_v29 }
 0x633   :  { %2463 = vmatpush1.bf16.msra.mxu0 %v3020_v34  ;;  %2495 = vmatpush1.bf16.msra.mxu1 %v3023_v47 }
 0x634   :  { %2465 = vmatprep.subr.bf16.mxu0 %v3028_v53  ;;  %2497 = vmatprep.subr.bf16.mxu1 %v3030_v61 }
 0x637   :  { %2467 = vmatpush1.bf16.msra.mxu0 %v3032_v2  ;;  %2499 = vmatpush1.bf16.msra.mxu1 %v3035_v4 }
 0x638   :  { %2469 = vmatprep.subr.bf16.mxu0 %v3039_v23  ;;  %2501 = vmatprep.subr.bf16.mxu1 %v3041_v24 }
 0x63b   :  { %2471 = vmatpush1.bf16.msra.mxu0 %v3044_v43  ;;  %2503 = vmatpush1.bf16.msra.mxu1 %v3048_v18 }
 0x63c   :  { %2473 = vmatprep.subr.bf16.mxu0 %v3050_v26  ;;  %2505 = vmatprep.subr.bf16.mxu1 %v3052_v44 }
 0x63f   :  { %2475 = vmatpush1.bf16.msra.mxu0 %v3055_v63  ;;  %2507 = vmatpush1.bf16.msra.mxu1 %v3059_v7 }
 0x6f5   :  { %v1619_v20 = vpop.f32.mrb[12].mxu0  ;;  %v1690_v21 = vpop.f32.mrb[12].mxu1 }
 0x6f6   :  { %v1695_v28 = vadd.f32 %v1619_v20, %v1485_v1  ;;  %v1621_v38 = vpop.f32.mrb[13].mxu0  ;;  %v1692_v9 = vpop.f32.mrb[13].mxu1  ;;  %v1697_v12 = vadd.f32 %v1690_v21, %v1487_v60 }
 0x6f7   :  { %v1696_v22 = vadd.f32 %v1621_v38, %v1486_v17  ;;  %v1698_v51 = vadd.f32 %v1692_v9, %v1488_v8 }
 0x6f8   :  { %v1699_v36 = vmul.f32 0.5, %v1695_v28  ;;  %v1701_v29 = vmul.f32 0.5, %v1697_v12 }
 0x6f9   :  { %v1700_v48 = vmul.f32 0.5, %v1696_v22 }
 0x6fa   :  { %2579 = vtanh.f32 %v1699_v36 }
 0x6fb   :  { %2581 = vtanh.f32 %v1700_v48 }
 0x6fc   :  { %2583 = vtanh.f32 %v1698_v51 }
 0x6fd   :  { %2585 = vtanh.f32 %v1701_v29 }
 0x704   :  { %v2580_v34 = vpop.eup %2579 }
 0x705   :  { %v1705_v47 = vmul.f32 0.5, %v2580_v34  ;;  %v2582_v53 = vpop.eup %2581 }
 0x706   :  { %v1706_v2 = vmul.f32 0.5, %v2582_v53  ;;  %v2584_v4 = vpop.eup %2583 }
 0x707   :  { %v1708_v61 = vadd.f32 0.5, %v1705_v47  ;;  %v2586_v26 = vpop.eup %2585 }
 0x708   :  { %v1709_v23 = vadd.f32 0.5, %v1706_v2  ;;  %v1707_v44 = vmul.f32 0.5, %v2586_v26 }
 0x709   :  { %v1713_v24 = vmul.f32 %v2584_v4, %v1708_v61 }
 0x70a   :  { %v1712_v43 = vmul.f32 %v1709_v23, %v3145_v46  ;;  %v1710_v63 = vadd.f32 0.5, %v1707_v44 }
 0x70c   :  { %v1714_v18 = vadd.f32 %v1713_v24, %v1712_v43 }
 0x70e   :  { %1720 = vst [vmem:[#allocation10 + $0x30] sm:$0xff] %v1714_v18  ;;  %2587 = vtanh.f32 %v1714_v18 }
 0x718   :  { %v2588_v7 = vpop.eup %2587 }
 0x719   :  { %v1716_v57 = vmul.f32 %v2588_v7, %v1710_v63 }
 0x71b   :  { %1718 = vst [vmem:[#allocation9 + $0x30] sm:$0xff] %v1716_v57  ;;  %1857 = vmatmul.mubr.f32.vlgmr.msra.gmra.mrb[14].mxu0 %v1716_v57  ;;  %1928 = vmatmul.mubr.f32.vlgmr.msra.gmra.mrb[14].mxu1 %v1716_v57 }
 0x7ee   :  { %v1858_v35 = vpop.f32.mrb[14].mxu0  ;;  %v1929_v50 = vpop.f32.mrb[14].mxu1 }
 0x7ef   :  { %v1934_v52 = vadd.f32 %v1858_v35, %v1724_v27  ;;  %v1860_v54 = vpop.f32.mrb[15].mxu0  ;;  %v1931_v59 = vpop.f32.mrb[15].mxu1  ;;  %v1936_v55 = vadd.f32 %v1929_v50, %v1726_v14 }
 0x7f0   :  { %v1935_v3 = vadd.f32 %v1860_v54, %v1725_v42  ;;  %v1937_v13 = vadd.f32 %v1931_v59, %v1727_v56 }
 0x7f1   :  { %v1938_v6 = vmul.f32 0.5, %v1934_v52  ;;  %v1940_v62 = vmul.f32 0.5, %v1936_v55 }
 0x7f2   :  { %v1939_v11 = vmul.f32 0.5, %v1935_v3 }
 0x7f3   :  { %2589 = vtanh.f32 %v1938_v6 }
 0x7f4   :  { %2591 = vtanh.f32 %v1939_v11 }
 0x7f5   :  { %2593 = vtanh.f32 %v1937_v13 }
 0x7f6   :  { %2595 = vtanh.f32 %v1940_v62 }
 0x7fd   :  { %v2590_v19 = vpop.eup %2589 }
 0x7fe   :  { %v1944_v31 = vmul.f32 0.5, %v2590_v19  ;;  %v2592_v33 = vpop.eup %2591 }
 0x7ff   :  { %v1945_v45 = vmul.f32 0.5, %v2592_v33  ;;  %v2594_v49 = vpop.eup %2593 }
 0x800   :  { %v1947_v37 = vadd.f32 0.5, %v1944_v31 }
 0x801   :  { %v1948_v16 = vadd.f32 0.5, %v1945_v45 }
 0x802   :  { %v1952_v30 = vmul.f32 %v2594_v49, %v1947_v37 }
 0x803   :  { %v1951_v32 = vmul.f32 %v1948_v16, %v1714_v18 }
 0x805   :  { %v1953_v46 = vadd.f32 %v1952_v30, %v1951_v32 }
 0x807   :  { %2597 = vtanh.f32 %v1953_v46  ;;  %1959 = vst [vmem:[#allocation10 + $0x38] sm:$0xff] %v1953_v46 }
 0x808   :  { %2654 = shalt.err (!%p2651_p6)
}
 0x809   :  { %s2655_s16 = scalar_lea.hbm %s3209_s3, 1024 }
 0x80a   :  { %p2656_p7 = scmp.ne.s32.totalorder %s3209_s3, %s2655_s16  ;;  %p2659_p8 = scmp.lt.u32.totalorder %s2655_s16, %s3209_s3 }
 0x80c   :  { %p2661_p9 = pnand %p2659_p8, %p2656_p7 }
 0x80e   :  { %2664 = shalt.err (!%p2661_p9)
}
 0x80f   :  { %s2703_s21 = smov 128   ;;  %s2704_s22 = smov 8   ;;  %v2596_v58 = vpop.eup %2595 }
 0x810   :  { %1985 = dma.vmem_to_hbm [thread:$0]  %s1980_s12, 1024, %s3209_s3, [#allocation11], %s2703_s21, %s2703_s21, %s2704_s22   ;;  %v1946_v10 = vmul.f32 0.5, %v2596_v58 }
 0x811   :  { %s2705_s25 = smov [#allocation9]   ;;  %v2598_v40 = vpop.eup %2597 }
 0x812   :  { %s1967_s26 = sshll.u32 %s2705_s25, 4  ;;  %v1949_v15 = vadd.f32 0.5, %v1946_v10  ;;  %s1968_s26 = int_to_ptr.vmem [resolvable:$true] %s1967_s26 }
 0x813   :  { %s2665_s27 = scalar_lea.vmem %s1968_s26, 1024  ;;  %p2670_p11 = scmp.lt.s32.totalorder %s1968_s26, %s1968_s26 }
 0x814   :  { %v1955_v25 = vmul.f32 %v2598_v40, %v1949_v15  ;;  %p2666_p10 = scmp.ne.s32.totalorder %s1968_s26, %s2665_s27  ;;  %p2671_p12 = scmp.lt.s32.totalorder %s2665_s27, %s2665_s27 }
 0x816   :  { %1957 = vst [vmem:[#allocation9 + $0x38] sm:$0xff] %v1955_v25  ;;  %p2672_p13 = por %p2671_p12, %p2670_p11 }
 0x818   :  { %p2673_p0 = pnand %p2672_p13, %p2666_p10 }
 0x81a   :  { %2676 = shalt.err (!%p2673_p0)
}
 0x81b   :  { %s2677_s3 = scalar_lea.hbm %s3208_s2, 1024 }
 0x81c   :  { %p2678_p1 = scmp.ne.s32.totalorder %s3208_s2, %s2677_s3  ;;  %p2681_p2 = scmp.lt.u32.totalorder %s2677_s3, %s3208_s2 }
 0x81e   :  { %p2683_p3 = pnand %p2681_p2, %p2678_p1 }
 0x820   :  { %2686 = shalt.err (!%p2683_p3)
}
 0x821   :  { %1973 = dma.vmem_to_hbm [thread:$0]  %s1968_s26, 1024, %s3208_s2, [#allocation6], %s2703_s21, %s2703_s21, %s2704_s22  }
 0x822   :  { %2691 = dma.done.wait [#allocation6], 1024  }
 0x823   :  { %2692 = vsyncadd [#allocation6], 4294966272 }
 0x824   :  { %2693 = dma.done.wait [#allocation11], 1024  }
 0x825   :  { %2694 = vsyncadd [#allocation11], 4294966272 }
 0x826   :  { %1992 = vsyncpa [#allocation5], 1 }
 0x827   :  { %1993 = vsyncpa [#allocation8], 1 }
 0x828   :  { %1994 = vsyncpa [#allocation6], 1 }
 0x829   :  { %1995 = vsyncpa [#allocation11], 1 }

</bundles_post_ra>
